<compile_context>
chip_gen: v5e
topology: v5e:2x2
jax: 0.10.0
libtpu: 0.0.40
codegen_flags: <defaults>
</compile_context>

<pallas_src>
import numpy as np
import jax
import jax.numpy as jnp
from jax.experimental import pallas as pl
from jax.experimental.pallas import tpu as pltpu  # noqa: F401  (TPU backend)

IN_CH, OUT_CH, K, STRIDE, PAD = 30, 43, 7, 1, 12
CROP = PAD - (K - 1)          # = 6
KKC = K * K * IN_CH           # 1470 contraction length (fed unpadded)
COUT_PAD = 128                # lane-dense output channels

# Crop-based formulation silently assumes these; make them loud.
assert STRIDE == 1 and PAD >= K - 1, (
    "crop-based ConvTranspose formulation requires stride=1 and padding >= K-1")


def _erf(x):
    # Abramowitz & Stegun 7.1.26, max abs error ~1.5e-7.
    # TODO(synk): lax.erf may not lower through Mosaic; polynomial used instead.
    # Exact reciprocal: epilogue touches ~9 vregs, so precision > cycles here.
    p = 0.3275911
    a1, a2, a3, a4, a5 = (0.254829592, -0.284496736, 1.421413741,
                          -1.453152027, 1.061405429)
    ax = jnp.abs(x)
    t = pl.reciprocal(1.0 + p * ax, approx=False)
    poly = ((((a5 * t + a4) * t + a3) * t + a2) * t + a1) * t
    e = 1.0 - poly * jnp.exp(-ax * ax)
    return jnp.where(x >= 0.0, e, -e)


def _matmul_bias_gelu_kernel(x_ref, w_ref, b_ref, o_ref):
    # x_ref: (M, KKC) bf16   w_ref: (KKC, 128) bf16
    # b_ref: (1, 128)  f32   o_ref: (M, 128)   f32
    acc = jnp.dot(x_ref[...], w_ref[...], preferred_element_type=jnp.float32)
    v1 = acc + b_ref[...]                              # conv_transpose + bias
    gelu = (v1 * 0.5) * (_erf(v1 * 0.7071067811865476) + 1.0)
    o_ref[...] = gelu.astype(o_ref.dtype)


def prepare_weights(w_torch, b):
    """One-time prep: flip, relayout, pad Cout only, cast. w_torch: (Cin,Cout,K,K)."""
    w_flip = jnp.transpose(w_torch[:, :, ::-1, ::-1], (2, 3, 0, 1))  # (K,K,Cin,Cout)
    w2d = w_flip.reshape(KKC, OUT_CH)
    w2d = jnp.pad(w2d, ((0, 0), (0, COUT_PAD - OUT_CH))).astype(jnp.bfloat16)
    b2 = jnp.pad(b.astype(jnp.float32),
                 (0, COUT_PAD - OUT_CH)).reshape(1, COUT_PAD)
    return w2d, b2


@jax.jit
def convt_gelu(x_nhwc, w2d, b2):
    """x_nhwc: (N,H,W,Cin) f32; w2d: (KKC,128) bf16; b2: (1,128) f32."""
    N, H, W, _ = x_nhwc.shape
    Ho = (H - 1) * STRIDE - 2 * PAD + K
    Wo = (W - 1) * STRIDE - 2 * PAD + K
    assert Ho > 0 and Wo > 0, "input too small for this transposed conv"

    # Only the central (Ho+K-1, Wo+K-1) window is ever read -> crop first,
    # and cast to bf16 BEFORE im2col so the stack/reshape chain moves half the bytes.
    xc = x_nhwc[:, CROP:CROP + Ho + K - 1,
                CROP:CROP + Wo + K - 1, :].astype(jnp.bfloat16)

    # im2col with (dh, dw, cin) column order, matching the weight reshape.
    patches = jnp.stack(
        [xc[:, dh:dh + Ho, dw:dw + Wo, :] for dh in range(K) for dw in range(K)],
        axis=3).reshape(N * Ho * Wo, KKC)

    rows = N * Ho * Wo
    out = pl.pallas_call(
        _matmul_bias_gelu_kernel,
        out_shape=jax.ShapeDtypeStruct((rows, COUT_PAD), jnp.float32),
        grid=(1,),
        in_specs=[
            pl.BlockSpec((rows, KKC), lambda i: (0, 0)),
            pl.BlockSpec((KKC, COUT_PAD), lambda i: (0, 0)),
            pl.BlockSpec((1, COUT_PAD), lambda i: (0, 0)),
        ],
        out_specs=pl.BlockSpec((rows, COUT_PAD), lambda i: (0, 0)),
    )(patches, w2d, b2)

    return out.reshape(N, Ho, Wo, COUT_PAD)[:, :, :, :OUT_CH]


if __name__ == "__main__":
    key = jax.random.PRNGKey(0)
    kx, kw, kb = jax.random.split(key, 3)

    N, H, W = 2, 24, 24                          # NCHW view: (2, 30, 24, 24)
    x_nchw = jax.random.normal(kx, (N, IN_CH, H, W), jnp.float32)
    bound = 1.0 / np.sqrt(IN_CH * K * K)         # deterministic synthetic init
    w = jax.random.uniform(kw, (IN_CH, OUT_CH, K, K), jnp.float32, -bound, bound)
    b = jax.random.uniform(kb, (OUT_CH,), jnp.float32, -bound, bound)

    x_nhwc = jnp.transpose(x_nchw, (0, 2, 3, 1))
    w2d, b2 = prepare_weights(w, b)              # hoisted one-time weight prep

    out = jax.block_until_ready(convt_gelu(x_nhwc, w2d, b2))

    # Reference with PyTorch ConvTranspose2d semantics on bf16-rounded operands
    # (the kernel feeds the MXU in bf16 with f32 accumulation).
    xn = np.asarray(x_nhwc.astype(jnp.bfloat16).astype(jnp.float32))
    wn = np.asarray(w.astype(jnp.bfloat16).astype(jnp.float32))
    bn = np.asarray(b)
    yf = np.zeros((N, H + K - 1, W + K - 1, OUT_CH), np.float32)
    for kh in range(K):
        for kw_ in range(K):
            yf[:, kh:kh + H, kw_:kw_ + W, :] += np.einsum(
                "nhwc,cd->nhwd", xn, wn[:, :, kh, kw_])
    v1 = yf[:, PAD:H + K - 1 - PAD, PAD:W + K - 1 - PAD, :] + bn
    erf = np.asarray(jax.scipy.special.erf(jnp.asarray(v1) * 0.7071067811865476))
    ref = (v1 * 0.5) * (erf + 1.0)

    assert out.shape == ref.shape, (out.shape, ref.shape)
    max_err = float(np.max(np.abs(np.asarray(out) - ref)))
    assert np.allclose(np.asarray(out), ref, rtol=2e-3, atol=2e-3), max_err
    print("KERNEL_OK")
</pallas_src>

<mosaic_0001>
module attributes {stable_mosaic.version = 11 : i64} {
  func.func @_matmul_bias_gelu_kernel(%arg0: i32, %arg1: memref<72x1470xbf16, #tpu.memory_space<vmem>>, %arg2: memref<1470x128xbf16, #tpu.memory_space<vmem>>, %arg3: memref<1x128xf32, #tpu.memory_space<vmem>>, %arg4: memref<72x128xf32, #tpu.memory_space<vmem>>) attributes {dimension_semantics = [#tpu.dimension_semantics<arbitrary>], iteration_bounds = array<i64: 1>, scalar_prefetch = 0 : i64, scratch_operands = 0 : i64, tpu.core_type = #tpu.core_type<tc>, window_params = [{pipeline_mode = #tpu.pipeline_mode<synchronous>, transform_indices = @transform_0, window_bounds = array<i64: 72, 1470>}, {pipeline_mode = #tpu.pipeline_mode<synchronous>, transform_indices = @transform_1, window_bounds = array<i64: 1470, 128>}, {pipeline_mode = #tpu.pipeline_mode<synchronous>, transform_indices = @transform_2, window_bounds = array<i64: 1, 128>}, {pipeline_mode = #tpu.pipeline_mode<synchronous>, transform_indices = @transform_3, window_bounds = array<i64: 72, 128>}]} {
    %c0 = arith.constant 0 : index
    %c0_0 = arith.constant 0 : index
    %0 = vector.load %arg1[%c0, %c0_0] : memref<72x1470xbf16, #tpu.memory_space<vmem>>, vector<72x1470xbf16>
    %c0_1 = arith.constant 0 : index
    %c0_2 = arith.constant 0 : index
    %1 = vector.load %arg2[%c0_1, %c0_2] : memref<1470x128xbf16, #tpu.memory_space<vmem>>, vector<1470x128xbf16>
    %cst = arith.constant dense<0.000000e+00> : vector<72x128xf32>
    %2 = tpu.matmul %0, %1, %cst {dimension_numbers = #tpu.dot_dimension_numbers<[1], [0], [0], [1], [0, 0, 1, 1], [], []>} : vector<72x1470xbf16>, vector<1470x128xbf16>, vector<72x128xf32> -> vector<72x128xf32>
    %c0_3 = arith.constant 0 : index
    %c0_4 = arith.constant 0 : index
    %3 = vector.load %arg3[%c0_3, %c0_4] : memref<1x128xf32, #tpu.memory_space<vmem>>, vector<1x128xf32>
    %4 = vector.broadcast %3 : vector<1x128xf32> to vector<72x128xf32>
    %5 = arith.addf %2, %4 : vector<72x128xf32>
    %cst_5 = arith.constant 5.000000e-01 : f32
    %6 = vector.broadcast %cst_5 : f32 to vector<72x128xf32>
    %7 = arith.mulf %5, %6 : vector<72x128xf32>
    %cst_6 = arith.constant 0.707106769 : f32
    %8 = vector.broadcast %cst_6 : f32 to vector<72x128xf32>
    %9 = arith.mulf %5, %8 : vector<72x128xf32>
    %10 = math.absf %9 : vector<72x128xf32>
    %cst_7 = arith.constant 0.327591091 : f32
    %11 = vector.broadcast %cst_7 : f32 to vector<72x128xf32>
    %12 = arith.mulf %11, %10 : vector<72x128xf32>
    %cst_8 = arith.constant 1.000000e+00 : f32
    %13 = vector.broadcast %cst_8 : f32 to vector<72x128xf32>
    %14 = arith.addf %13, %12 : vector<72x128xf32>
    %15 = tpu.reciprocal %14 : vector<72x128xf32> -> vector<72x128xf32>
    %cst_9 = arith.constant 1.06140542 : f32
    %16 = vector.broadcast %cst_9 : f32 to vector<72x128xf32>
    %17 = arith.mulf %16, %15 : vector<72x128xf32>
    %cst_10 = arith.constant -1.45315206 : f32
    %18 = vector.broadcast %cst_10 : f32 to vector<72x128xf32>
    %19 = arith.addf %17, %18 : vector<72x128xf32>
    %20 = arith.mulf %19, %15 : vector<72x128xf32>
    %cst_11 = arith.constant 1.42141378 : f32
    %21 = vector.broadcast %cst_11 : f32 to vector<72x128xf32>
    %22 = arith.addf %20, %21 : vector<72x128xf32>
    %23 = arith.mulf %22, %15 : vector<72x128xf32>
    %cst_12 = arith.constant -0.284496725 : f32
    %24 = vector.broadcast %cst_12 : f32 to vector<72x128xf32>
    %25 = arith.addf %23, %24 : vector<72x128xf32>
    %26 = arith.mulf %25, %15 : vector<72x128xf32>
    %cst_13 = arith.constant 0.254829586 : f32
    %27 = vector.broadcast %cst_13 : f32 to vector<72x128xf32>
    %28 = arith.addf %26, %27 : vector<72x128xf32>
    %29 = arith.mulf %28, %15 : vector<72x128xf32>
    %cst_14 = arith.constant 0.000000e+00 : f32
    %30 = vector.broadcast %cst_14 : f32 to vector<72x128xf32>
    %31 = arith.subf %30, %10 : vector<72x128xf32>
    %32 = arith.mulf %31, %10 : vector<72x128xf32>
    %33 = math.exp %32 : vector<72x128xf32>
    %34 = arith.mulf %29, %33 : vector<72x128xf32>
    %cst_15 = arith.constant 1.000000e+00 : f32
    %35 = vector.broadcast %cst_15 : f32 to vector<72x128xf32>
    %36 = arith.subf %35, %34 : vector<72x128xf32>
    %cst_16 = arith.constant 0.000000e+00 : f32
    %37 = vector.broadcast %cst_16 : f32 to vector<72x128xf32>
    %38 = arith.cmpf oge, %9, %37 : vector<72x128xf32>
    %cst_17 = arith.constant 0.000000e+00 : f32
    %39 = vector.broadcast %cst_17 : f32 to vector<72x128xf32>
    %40 = arith.subf %39, %36 : vector<72x128xf32>
    %41 = arith.select %38, %36, %40 : vector<72x128xi1>, vector<72x128xf32>
    %cst_18 = arith.constant 1.000000e+00 : f32
    %42 = vector.broadcast %cst_18 : f32 to vector<72x128xf32>
    %43 = arith.addf %41, %42 : vector<72x128xf32>
    %44 = arith.mulf %7, %43 : vector<72x128xf32>
    %c0_19 = arith.constant 0 : index
    %c0_20 = arith.constant 0 : index
    %45 = vector.load %arg4[%c0_19, %c0_20] : memref<72x128xf32, #tpu.memory_space<vmem>>, vector<72x128xf32>
    tpu.vector_store %arg4[%c0_19, %c0_20], %44 {strides = array<i32>} : memref<72x128xf32, #tpu.memory_space<vmem>>, vector<72x128xf32>,
    return
  }
  func.func @transform_0(%arg0: i32) -> (i32, i32) {
    %c0_i32 = arith.constant 0 : i32
    %c0_i32_0 = arith.constant 0 : i32
    %c0_i32_1 = arith.constant 0 : i32
    return %c0_i32, %c0_i32_0 : i32, i32
  }
  func.func @transform_1(%arg0: i32) -> (i32, i32) {
    %c0_i32 = arith.constant 0 : i32
    %c0_i32_0 = arith.constant 0 : i32
    %c0_i32_1 = arith.constant 0 : i32
    return %c0_i32, %c0_i32_0 : i32, i32
  }
  func.func @transform_2(%arg0: i32) -> (i32, i32) {
    %c0_i32 = arith.constant 0 : i32
    %c0_i32_0 = arith.constant 0 : i32
    %c0_i32_1 = arith.constant 0 : i32
    return %c0_i32, %c0_i32_0 : i32, i32
  }
  func.func @transform_3(%arg0: i32) -> (i32, i32) {
    %c0_i32 = arith.constant 0 : i32
    %c0_i32_0 = arith.constant 0 : i32
    %c0_i32_1 = arith.constant 0 : i32
    return %c0_i32, %c0_i32_0 : i32, i32
  }
}

</mosaic_0001>

<bundles_post_ra>
// kernel: convt_gelu.1
= control target key start
LH: loop header
LB: loop body
LE: loop exit
PB: predicated region body
PF: predicated region fallthrough
CT: control target
= control target key end

     0   :  { %vm1101_vm0 = vcmask 1046528   ;;  %vm1085_vm1 = vcmask 506880   ;;  %s3554_s1 = inlined_call_operand.vmem [shape: bf16[1470,128], index: 1, kind: input, shape index: {}]   ;;  %s3555_s2 = inlined_call_operand.vmem [shape: f32[1,128], index: 2, kind: input, shape index: {}]   ;;  %s3556_s0 = inlined_call_operand.vmem [shape: bf16[72,1470], index: 0, kind: input, shape index: {}]   ;;  %s3557_s3 = inlined_call_operand.vmem [shape: f32[72,128], index: 3, kind: output, shape index: {}]  }
   0x1   :  { %v2485_v0 = vld [vmem:[%s3554_s1 + $0x38] sm:$0xff]  ;;  %v2484_v4 = vld [vmem:[%s3554_s1 + $0x30] sm:$0xff]  ;;  %v2483_v8 = vld [vmem:[%s3554_s1 + $0x28] sm:$0xff] }
   0x2   :  { %v2493_v1 = vld [vmem:[%s3554_s1 + $0x78] sm:$0xff]  ;;  %1105 = vmatpush.bf16.msra.mxu0 %v2485_v0  ;;  %v2492_v5 = vld [vmem:[%s3554_s1 + $0x70] sm:$0xff]  ;;  %v2491_v9 = vld [vmem:[%s3554_s1 + $0x68] sm:$0xff] }
   0x3   :  { %v2501_v2 = vld [vmem:[%s3554_s1 + $0xb8] sm:$0xff]  ;;  %1138 = vmatpush.bf16.msra.mxu1 %v2493_v1  ;;  %v2500_v6 = vld [vmem:[%s3554_s1 + $0xb0] sm:$0xff]  ;;  %v2499_v10 = vld [vmem:[%s3554_s1 + $0xa8] sm:$0xff] }
   0x4   :  { %v2509_v3 = vld [vmem:[%s3554_s1 + $0xf8] sm:$0xff]  ;;  %1171 = vmatpush.bf16.msra.mxu2 %v2501_v2  ;;  %v2508_v7 = vld [vmem:[%s3554_s1 + $0xf0] sm:$0xff]  ;;  %v2507_v11 = vld [vmem:[%s3554_s1 + $0xe8] sm:$0xff] }
   0x5   :  { %1204 = vmatpush.bf16.msra.mxu3 %v2509_v3  ;;  %v2482_v12 = vld [vmem:[%s3554_s1 + $0x20] sm:$0xff]  ;;  %v2481_v16 = vld [vmem:[%s3554_s1 + $0x18] sm:$0xff]  ;;  %v2480_v20 = vld [vmem:[%s3554_s1 + $0x10] sm:$0xff] }
   0x6   :  { %1106 = vmatpush.bf16.msra.mxu0 %v2484_v4  ;;  %v2490_v13 = vld [vmem:[%s3554_s1 + $0x60] sm:$0xff]  ;;  %v2489_v17 = vld [vmem:[%s3554_s1 + $0x58] sm:$0xff]  ;;  %v2488_v21 = vld [vmem:[%s3554_s1 + $0x50] sm:$0xff] }
   0x7   :  { %1139 = vmatpush.bf16.msra.mxu1 %v2492_v5  ;;  %v2498_v14 = vld [vmem:[%s3554_s1 + $0xa0] sm:$0xff]  ;;  %v2497_v18 = vld [vmem:[%s3554_s1 + $0x98] sm:$0xff]  ;;  %v2496_v22 = vld [vmem:[%s3554_s1 + $0x90] sm:$0xff] }
   0x8   :  { %1172 = vmatpush.bf16.msra.mxu2 %v2500_v6  ;;  %v2506_v15 = vld [vmem:[%s3554_s1 + $0xe0] sm:$0xff]  ;;  %v2505_v19 = vld [vmem:[%s3554_s1 + $0xd8] sm:$0xff]  ;;  %v2504_v23 = vld [vmem:[%s3554_s1 + $0xd0] sm:$0xff] }
   0x9   :  { %1205 = vmatpush.bf16.msra.mxu3 %v2508_v7  ;;  %v2479_v24 = vld [vmem:[%s3554_s1 + $0x8] sm:$0xff]  ;;  %v2478_v28 = vld [vmem:[%s3554_s1] sm:$0xff]  ;;  %v2436_v33 = vld [vmem:[%s3556_s0 + $0x2c] sm:$0xf0] }
   0xa   :  { %1107 = vmatpush.bf16.msra.mxu0 %v2483_v8  ;;  %v2487_v25 = vld [vmem:[%s3554_s1 + $0x48] sm:$0xff]  ;;  %v2486_v29 = vld [vmem:[%s3554_s1 + $0x40] sm:$0xff]  ;;  %v1869_v35 = vld [vmem:[%s3556_s0 + $0x30] sm:$0xf0] }
   0xb   :  { %1140 = vmatpush.bf16.msra.mxu1 %v2491_v9  ;;  %v2495_v26 = vld [vmem:[%s3554_s1 + $0x88] sm:$0xff]  ;;  %v2494_v30 = vld [vmem:[%s3554_s1 + $0x80] sm:$0xff]  ;;  %v2437_v37 = vld [vmem:[%s3556_s0 + $0x34] sm:$0xf0] }
   0xc   :  { %1173 = vmatpush.bf16.msra.mxu2 %v2499_v10  ;;  %v2503_v27 = vld [vmem:[%s3554_s1 + $0xc8] sm:$0xff]  ;;  %v2502_v31 = vld [vmem:[%s3554_s1 + $0xc0] sm:$0xff]  ;;  %v1877_v39 = vld [vmem:[%s3556_s0 + $0x38] sm:$0xf0] }
   0xd   :  { %1206 = vmatpush.bf16.msra.mxu3 %v2507_v11  ;;  %v1867_v32 = vld [vmem:[%s3556_s0] sm:$0xf]  ;;  %v2430_v34 = vld [vmem:[%s3556_s0 + $0x4] sm:$0xf]  ;;  %v1875_v36 = vld [vmem:[%s3556_s0 + $0x8] sm:$0xf] }
   0xe   :  { %1108 = vmatpush.bf16.msra.mxu0 %v2482_v12  ;;  %v2431_v38 = vld [vmem:[%s3556_s0 + $0xc] sm:$0xf]  ;;  %v2533_v40 = vld [vmem:[%s3554_s1 + $0x1b8] sm:$0xff]  ;;  %v1868_v42 = vor.u32 %v2436_v33, %v1867_v32  ;;  %v1872_v43 = vor.u32 %v2430_v34, %v1869_v35  ;;  %v1876_v44 = vor.u32 %v2437_v37, %v1875_v36  ;;  %v2532_v48 = vld [vmem:[%s3554_s1 + $0x1b0] sm:$0xff] }
   0xf   :  { %1141 = vmatpush.bf16.msra.mxu1 %v2490_v13  ;;  %v2517_v41 = vld [vmem:[%s3554_s1 + $0x138] sm:$0xff]  ;;  %v1880_v45 = vor.u32 %v2431_v38, %v1877_v39  ;;  %v2516_v49 = vld [vmem:[%s3554_s1 + $0x130] sm:$0xff]  ;;  %v2531_v52 = vld [vmem:[%s3554_s1 + $0x1a8] sm:$0xff] }
  0x10   :  { %1174 = vmatpush.bf16.msra.mxu2 %v2498_v14  ;;  %v2541_v46 = vld [vmem:[%s3554_s1 + $0x1f8] sm:$0xff]  ;;  %v2540_v50 = vld [vmem:[%s3554_s1 + $0x1f0] sm:$0xff]  ;;  %v2515_v53 = vld [vmem:[%s3554_s1 + $0x128] sm:$0xff] }
  0x11   :  { %1207 = vmatpush.bf16.msra.mxu3 %v2506_v15  ;;  %v2525_v47 = vld [vmem:[%s3554_s1 + $0x178] sm:$0xff]  ;;  %v2524_v51 = vld [vmem:[%s3554_s1 + $0x170] sm:$0xff]  ;;  %v2539_v54 = vld [vmem:[%s3554_s1 + $0x1e8] sm:$0xff] }
  0x12   :  { %1109 = vmatpush.bf16.msra.mxu0 %v2481_v16  ;;  %v2523_v55 = vld [vmem:[%s3554_s1 + $0x168] sm:$0xff]  ;;  %v1915_v56 = vld [vmem:[%s3556_s0 + $0x60] sm:$0xf]  ;;  %v2448_v59 = vld [vmem:[%s3556_s0 + $0x8c] sm:$0xf0] }
  0x13   :  { %1142 = vmatpush.bf16.msra.mxu1 %v2489_v17  ;;  %v2530_v57 = vld [vmem:[%s3554_s1 + $0x1a0] sm:$0xff]  ;;  %v1917_v61 = vld [vmem:[%s3556_s0 + $0x90] sm:$0xf0]  ;;  %v1923_v62 = vld [vmem:[%s3556_s0 + $0x68] sm:$0xf]  ;;  %v1916_v6 = vor.u32 %v2448_v59, %v1915_v56 }
  0x14   :  { %1175 = vmatpush.bf16.msra.mxu2 %v2497_v18  ;;  %v2514_v58 = vld [vmem:[%s3554_s1 + $0x120] sm:$0xff]  ;;  %v2449_v63 = vld [vmem:[%s3556_s0 + $0x94] sm:$0xf0]  ;;  %v2443_v0 = vld [vmem:[%s3556_s0 + $0x6c] sm:$0xf] }
  0x15   :  { %1208 = vmatpush.bf16.msra.mxu3 %v2505_v19  ;;  %v2442_v60 = vld [vmem:[%s3556_s0 + $0x64] sm:$0xf]  ;;  %v1925_v1 = vld [vmem:[%s3556_s0 + $0x98] sm:$0xf0]  ;;  %v1924_v8 = vor.u32 %v2449_v63, %v1923_v62  ;;  %v2528_v12 = vld [vmem:[%s3554_s1 + $0x190] sm:$0xff] }
  0x16   :  { %1110 = vmatpush.bf16.msra.mxu0 %v2480_v20  ;;  %v2538_v2 = vld [vmem:[%s3554_s1 + $0x1e0] sm:$0xff]  ;;  %v2529_v4 = vld [vmem:[%s3554_s1 + $0x198] sm:$0xff]  ;;  %v1920_v7 = vor.u32 %v2442_v60, %v1917_v61  ;;  %v1928_v9 = vor.u32 %v2443_v0, %v1925_v1  ;;  %v2512_v13 = vld [vmem:[%s3554_s1 + $0x110] sm:$0xff] }
  0x17   :  { %1143 = vmatpush.bf16.msra.mxu1 %v2488_v21  ;;  %v2522_v3 = vld [vmem:[%s3554_s1 + $0x160] sm:$0xff]  ;;  %v2513_v5 = vld [vmem:[%s3554_s1 + $0x118] sm:$0xff]  ;;  %v2536_v14 = vld [vmem:[%s3554_s1 + $0x1d0] sm:$0xff] }
  0x18   :  { %1176 = vmatpush.bf16.msra.mxu2 %v2496_v22  ;;  %v2537_v10 = vld [vmem:[%s3554_s1 + $0x1d8] sm:$0xff]  ;;  %v2520_v15 = vld [vmem:[%s3554_s1 + $0x150] sm:$0xff]  ;;  %v2527_v16 = vld [vmem:[%s3554_s1 + $0x188] sm:$0xff] }
  0x19   :  { %1209 = vmatpush.bf16.msra.mxu3 %v2504_v23  ;;  %v2521_v11 = vld [vmem:[%s3554_s1 + $0x158] sm:$0xff]  ;;  %v2511_v17 = vld [vmem:[%s3554_s1 + $0x108] sm:$0xff]  ;;  %v1963_v19 = vld [vmem:[%s3556_s0 + $0xc0] sm:$0xf] }
  0x1a   :  { %1111 = vmatpush.bf16.msra.mxu0 %v2479_v24  ;;  %v2535_v18 = vld [vmem:[%s3554_s1 + $0x1c8] sm:$0xff]  ;;  %v2460_v20 = vld [vmem:[%s3556_s0 + $0xec] sm:$0xf0]  ;;  %v2454_v21 = vld [vmem:[%s3556_s0 + $0xc4] sm:$0xf] }
  0x1b   :  { %1144 = vmatpush.bf16.msra.mxu1 %v2487_v25  ;;  %v1965_v22 = vld [vmem:[%s3556_s0 + $0xf0] sm:$0xf0]  ;;  %v1971_v23 = vld [vmem:[%s3556_s0 + $0xc8] sm:$0xf]  ;;  %v2461_v24 = vld [vmem:[%s3556_s0 + $0xf4] sm:$0xf0] }
  0x1c   :  { %1177 = vmatpush.bf16.msra.mxu2 %v2495_v26  ;;  %v2455_v25 = vld [vmem:[%s3556_s0 + $0xcc] sm:$0xf]  ;;  %v1973_v26 = vld [vmem:[%s3556_s0 + $0xf8] sm:$0xf0]  ;;  %v2526_v32 = vld [vmem:[%s3554_s1 + $0x180] sm:$0xff] }
  0x1d   :  { %1210 = vmatpush.bf16.msra.mxu3 %v2503_v27  ;;  %v1964_v27 = vor.u32 %v2460_v20, %v1963_v19  ;;  %v2510_v33 = vld [vmem:[%s3554_s1 + $0x100] sm:$0xff]  ;;  %v2472_v37 = vld [vmem:[%s3556_s0 + $0x14c] sm:$0xf0]  ;;  %v2013_v39 = vld [vmem:[%s3556_s0 + $0x150] sm:$0xf0] }
  0x1e   :  { %1112 = vmatpush.bf16.msra.mxu0 %v2478_v28  ;;  %v1968_v28 = vor.u32 %v2454_v21, %v1965_v22  ;;  %v2534_v34 = vld [vmem:[%s3554_s1 + $0x1c0] sm:$0xff]  ;;  %v2556_v56 = vld [vmem:[%s3554_s1 + $0x270] sm:$0xff]  ;;  %v64_v59 = vld [vmem:[%s3556_s0 + $0x188] sm:$0xff] }
  0x1f   :  { %1145 = vmatpush.bf16.msra.mxu1 %v2486_v29  ;;  %v1972_v29 = vor.u32 %v2461_v24, %v1971_v23  ;;  %v2518_v35 = vld [vmem:[%s3554_s1 + $0x140] sm:$0xff]  ;;  %v409_v62 = vunpack.c.l.b16 %v64_v59  ;;  %v410_v63 = vunpack.c.h.b16 %v64_v59  ;;  %v2561_v23 = vld [vmem:[%s3554_s1 + $0x298] sm:$0xff]  ;;  %v2567_v24 = vld [vmem:[%s3554_s1 + $0x2c8] sm:$0xff] }
  0x20   :  { %1178 = vmatpush.bf16.msra.mxu2 %v2494_v30  ;;  %v1976_v30 = vor.u32 %v2455_v25, %v1973_v26  ;;  %v2011_v36 = vld [vmem:[%s3556_s0 + $0x120] sm:$0xf]  ;;  %v2466_v38 = vld [vmem:[%s3556_s0 + $0x124] sm:$0xf]  ;;  %v2545_v25 = vld [vmem:[%s3554_s1 + $0x218] sm:$0xff] }
  0x21   :  { %1211 = vmatpush.bf16.msra.mxu3 %v2502_v31  ;;  %1113 = vmatmul.bf16.vlgmr.msra.gmra.mxu0 %v1868_v42  ;;  %v2519_v31 = vld [vmem:[%s3554_s1 + $0x148] sm:$0xff]  ;;  %v2546_v21 = vld [vmem:[%s3554_s1 + $0x220] sm:$0xff]  ;;  %v2553_v26 = vld [vmem:[%s3554_s1 + $0x258] sm:$0xff] }
  0x22   :  { %1237 = vmatpush.bf16.msrb.mxu0 %v2517_v41  ;;  %1146 = vmatmul.bf16.vlgmr.msra.gmra.mxu1 %v1872_v43  ;;  %v2473_v41 = vld [vmem:[%s3556_s0 + $0x154] sm:$0xf0]  ;;  %v2467_v42 = vld [vmem:[%s3556_s0 + $0x12c] sm:$0xf]  ;;  %v2021_v43 = vld [vmem:[%s3556_s0 + $0x158] sm:$0xf0] }
  0x23   :  { %1179 = vmatmul.bf16.vlgmr.msra.gmra.mxu2 %v1876_v44  ;;  %1270 = vmatpush.bf16.msrb.mxu1 %v2525_v47  ;;  %v2012_v44 = vor.u32 %v2472_v37, %v2011_v36  ;;  %v2024_v47 = vor.u32 %v2467_v42, %v2021_v43  ;;  %v2554_v22 = vld [vmem:[%s3554_s1 + $0x260] sm:$0xff]  ;;  %v2552_v43 = vld [vmem:[%s3554_s1 + $0x250] sm:$0xff] }
  0x24   :  { %1303 = vmatpush.bf16.msrb.mxu2 %v2533_v40  ;;  %1212 = vmatmul.bf16.vlgmr.msra.gmra.mxu3 %v1880_v45  ;;  %v2019_v40 = vld [vmem:[%s3556_s0 + $0x128] sm:$0xf]  ;;  %v2016_v45 = vor.u32 %v2466_v38, %v2013_v39  ;;  %v2560_v39 = vld [vmem:[%s3554_s1 + $0x290] sm:$0xff]  ;;  %v2462_v42 = vld [vmem:[%s3556_s0 + $0xfc] sm:$0xf0] }
  0x25   :  { %1336 = vmatpush.bf16.msrb.mxu3 %v2541_v46  ;;  %v2020_v46 = vor.u32 %v2473_v41, %v2019_v40  ;;  %v2544_v40 = vld [vmem:[%s3554_s1 + $0x210] sm:$0xff]  ;;  %v2474_v59 = vld [vmem:[%s3556_s0 + $0x15c] sm:$0xf0] }
  0x26   :  { %1238 = vmatpush.bf16.msrb.mxu0 %v2516_v49  ;;  %v2549_v49 = vld [vmem:[%s3554_s1 + $0x238] sm:$0xff]  ;;  %v1979_v41 = vld [vmem:[%s3556_s0 + $0xd0] sm:$0xf] }
  0x27   :  { %1271 = vmatpush.bf16.msrb.mxu1 %v2524_v51  ;;  %v2569_v51 = vld [vmem:[%s3554_s1 + $0x2d8] sm:$0x70] }
  0x28   :  { %1304 = vmatpush.bf16.msrb.mxu2 %v2532_v48  ;;  %v2565_v48 = vld [vmem:[%s3554_s1 + $0x2b8] sm:$0xff] }
  0x29   :  { %1337 = vmatpush.bf16.msrb.mxu3 %v2540_v50  ;;  %v2423_v50 = vld [vmem:[%s3554_s1 + $0x2d8] sm:$0xf] }
  0x2a   :  { %1239 = vmatpush.bf16.msrb.mxu0 %v2515_v53  ;;  %v2424_v53 = vor.u32 %v2569_v51, %v2423_v50  ;;  %v1980_v50 = vor.u32 %v2462_v42, %v1979_v41 }
  0x2b   :  { %1272 = vmatpush.bf16.msrb.mxu1 %v2523_v55  ;;  %v2548_v55 = vld [vmem:[%s3554_s1 + $0x230] sm:$0xff] }
  0x2c   :  { %1305 = vmatpush.bf16.msrb.mxu2 %v2531_v52  ;;  %v2557_v52 = vld [vmem:[%s3554_s1 + $0x278] sm:$0xff] }
  0x2d   :  { %1338 = vmatpush.bf16.msrb.mxu3 %v2539_v54  ;;  %v2564_v54 = vld [vmem:[%s3554_s1 + $0x2b0] sm:$0xff] }
  0x2e   :  { %1240 = vmatpush.bf16.msrb.mxu0 %v2514_v58  ;;  %v1103_v58 = vsel %vm1101_vm0, %v2424_v53, 0 }
  0x2f   :  { %1273 = vmatpush.bf16.msrb.mxu1 %v2522_v3  ;;  %v470_v3 = vpack.c.b16 %v410_v63, %v410_v63  ;;  %v2550_v63 = vld [vmem:[%s3554_s1 + $0x240] sm:$0xff] }
  0x30   :  { %1306 = vmatpush.bf16.msrb.mxu2 %v2530_v57  ;;  %v63_v57 = vld [vmem:[%s3556_s0 + $0x180] sm:$0xff] }
  0x31   :  { %1339 = vmatpush.bf16.msrb.mxu3 %v2538_v2  ;;  %1118 = vmatmul.bf16.gmra.mxu0 %v1916_v6  ;;  %v407_v60 = vunpack.c.l.b16 %v63_v57  ;;  %v408_v61 = vunpack.c.h.b16 %v63_v57  ;;  %v469_v2 = vpack.c.b16 %v409_v62, %v409_v62  ;;  %v2568_v6 = vld [vmem:[%s3554_s1 + $0x2d0] sm:$0xff]  ;;  %v2551_v57 = vld [vmem:[%s3554_s1 + $0x248] sm:$0xff]  ;;  %v2542_v62 = vld [vmem:[%s3554_s1 + $0x200] sm:$0xff] }
  0x32   :  { %1241 = vmatpush.bf16.msrb.mxu0 %v2513_v5  ;;  %1151 = vmatmul.bf16.gmra.mxu1 %v1920_v7  ;;  %v2547_v5 = vld [vmem:[%s3554_s1 + $0x228] sm:$0xff] }
  0x33   :  { %1184 = vmatmul.bf16.gmra.mxu2 %v1924_v8  ;;  %1274 = vmatpush.bf16.msrb.mxu1 %v2521_v11  ;;  %v467_v0 = vpack.c.b16 %v407_v60, %v407_v60  ;;  %v468_v1 = vpack.c.b16 %v408_v61, %v408_v61  ;;  %v2555_v7 = vld [vmem:[%s3554_s1 + $0x268] sm:$0xff]  ;;  %v2562_v8 = vld [vmem:[%s3554_s1 + $0x2a0] sm:$0xff]  ;;  %v2432_v11 = vld [vmem:[%s3556_s0 + $0x14] sm:$0xf] }
  0x34   :  { %1307 = vmatpush.bf16.msrb.mxu2 %v2529_v4  ;;  %1217 = vmatmul.bf16.gmra.mxu3 %v1928_v9  ;;  %v2563_v4 = vld [vmem:[%s3554_s1 + $0x2a8] sm:$0xff]  ;;  %v1883_v9 = vld [vmem:[%s3556_s0 + $0x10] sm:$0xf]  ;;  %v3080_v60 = vld [vmem:[%s3555_s2] ss:$0 sm:$0xff] }
  0x35   :  { %1340 = vmatpush.bf16.msrb.mxu3 %v2537_v10  ;;  %v2438_v10 = vld [vmem:[%s3556_s0 + $0x3c] sm:$0xf0] }
  0x36   :  { %1242 = vmatpush.bf16.msrb.mxu0 %v2512_v13  ;;  %v1891_v13 = vld [vmem:[%s3556_s0 + $0x18] sm:$0xf]  ;;  %v2558_v61 = vld [vmem:[%s3554_s1 + $0x280] sm:$0xff] }
  0x37   :  { %1275 = vmatpush.bf16.msrb.mxu1 %v2520_v15  ;;  %v2433_v15 = vld [vmem:[%s3556_s0 + $0x1c] sm:$0xf] }
  0x38   :  { %1308 = vmatpush.bf16.msrb.mxu2 %v2528_v12  ;;  %v1885_v12 = vld [vmem:[%s3556_s0 + $0x40] sm:$0xf0] }
  0x39   :  { %1341 = vmatpush.bf16.msrb.mxu3 %v2536_v14  ;;  %v2439_v14 = vld [vmem:[%s3556_s0 + $0x44] sm:$0xf0] }
  0x3a   :  { %1243 = vmatpush.bf16.msrb.mxu0 %v2511_v17  ;;  %v1884_v17 = vor.u32 %v2438_v10, %v1883_v9  ;;  %v1892_v19 = vor.u32 %v2439_v14, %v1891_v13 }
  0x3b   :  { %1276 = vmatpush.bf16.msrb.mxu1 %v2519_v31  ;;  %v1939_v31 = vld [vmem:[%s3556_s0 + $0x78] sm:$0xf] }
  0x3c   :  { %1309 = vmatpush.bf16.msrb.mxu2 %v2527_v16  ;;  %v1893_v16 = vld [vmem:[%s3556_s0 + $0x48] sm:$0xf0] }
  0x3d   :  { %1342 = vmatpush.bf16.msrb.mxu3 %v2535_v18  ;;  %v1888_v18 = vor.u32 %v2432_v11, %v1885_v12  ;;  %v1896_v20 = vor.u32 %v2433_v15, %v1893_v16 }
  0x3e   :  { %1244 = vmatpush.bf16.msrb.mxu0 %v2510_v33  ;;  %v2445_v33 = vld [vmem:[%s3556_s0 + $0x7c] sm:$0xf] }
  0x3f   :  { %1277 = vmatpush.bf16.msrb.mxu1 %v2518_v35 }
  0x40   :  { %1310 = vmatpush.bf16.msrb.mxu2 %v2526_v32  ;;  %v2451_v32 = vld [vmem:[%s3556_s0 + $0xa4] sm:$0xf0] }
  0x41   :  { %1123 = vmatmul.bf16.gmra.mxu0 %v1964_v27  ;;  %1343 = vmatpush.bf16.msrb.mxu3 %v2534_v34  ;;  %v1931_v27 = vld [vmem:[%s3556_s0 + $0x70] sm:$0xf]  ;;  %v1941_v34 = vld [vmem:[%s3556_s0 + $0xa8] sm:$0xf0]  ;;  %v1940_v37 = vor.u32 %v2451_v32, %v1939_v31 }
  0x42   :  { %1156 = vmatmul.bf16.gmra.mxu1 %v1968_v28  ;;  %1369 = vmatpush.bf16.msra.mxu0 %v2549_v49  ;;  %v2450_v28 = vld [vmem:[%s3556_s0 + $0x9c] sm:$0xf0]  ;;  %v1944_v38 = vor.u32 %v2445_v33, %v1941_v34  ;;  %v1989_v49 = vld [vmem:[%s3556_s0 + $0x108] sm:$0xf0] }
  0x43   :  { %1189 = vmatmul.bf16.gmra.mxu2 %v1972_v29  ;;  %1402 = vmatpush.bf16.msra.mxu1 %v2557_v52  ;;  %v2444_v29 = vld [vmem:[%s3556_s0 + $0x74] sm:$0xf]  ;;  %v1932_v35 = vor.u32 %v2450_v28, %v1931_v27 }
  0x44   :  { %1222 = vmatmul.bf16.gmra.mxu3 %v1976_v30  ;;  %1435 = vmatpush.bf16.msra.mxu2 %v2565_v48  ;;  %v1933_v30 = vld [vmem:[%s3556_s0 + $0xa0] sm:$0xf0]  ;;  %v2457_v48 = vld [vmem:[%s3556_s0 + $0xdc] sm:$0xf] }
  0x45   :  { %1472 = vmatpush.bf16.msra.mxu3 %v1103_v58  ;;  %v1936_v36 = vor.u32 %v2444_v29, %v1933_v30  ;;  %v1992_v53 = vor.u32 %v2457_v48, %v1989_v49  ;;  %v2027_v58 = vld [vmem:[%s3556_s0 + $0x130] sm:$0xf]  ;;  %v1899_v48 = vld [vmem:[%s3556_s0 + $0x20] sm:$0xf] }
  0x46   :  { %1370 = vmatpush.bf16.msra.mxu0 %v2548_v55  ;;  %v2543_v55 = vld [vmem:[%s3554_s1 + $0x208] sm:$0xff]  ;;  %v2440_v49 = vld [vmem:[%s3556_s0 + $0x4c] sm:$0xf0] }
  0x47   :  { %1403 = vmatpush.bf16.msra.mxu1 %v2556_v56  ;;  %v2566_v56 = vld [vmem:[%s3554_s1 + $0x2c0] sm:$0xff] }
  0x48   :  { %1436 = vmatpush.bf16.msra.mxu2 %v2564_v54  ;;  %v2559_v54 = vld [vmem:[%s3554_s1 + $0x288] sm:$0xff] }
  0x49   :  { %1473 = vmatpush.bf16.msra.mxu3 %v2568_v6  ;;  %v2028_v6 = vor.u32 %v2474_v59, %v2027_v58  ;;  %v1900_v58 = vor.u32 %v2440_v49, %v1899_v48  ;;  %v2003_v48 = vld [vmem:[%s3556_s0 + $0xe8] sm:$0xf]  ;;  %v2465_v49 = vld [vmem:[%s3556_s0 + $0x114] sm:$0xf0] }
  0x4a   :  { %1371 = vmatpush.bf16.msra.mxu0 %v2547_v5  ;;  %v2037_v5 = vld [vmem:[%s3556_s0 + $0x168] sm:$0xf0] }
  0x4b   :  { %1404 = vmatpush.bf16.msra.mxu1 %v2555_v7 }
  0x4c   :  { %1437 = vmatpush.bf16.msra.mxu2 %v2563_v4  ;;  %v2469_v4 = vld [vmem:[%s3556_s0 + $0x13c] sm:$0xf] }
  0x4d   :  { %1474 = vmatpush.bf16.msra.mxu3 %v2567_v24  ;;  %v2040_v11 = vor.u32 %v2469_v4, %v2037_v5 }
  0x4e   :  { %1372 = vmatpush.bf16.msra.mxu0 %v2546_v21  ;;  %v66_v21 = vld [vmem:[%s3556_s0 + $0x198] sm:$0xff] }
  0x4f   :  { %1405 = vmatpush.bf16.msra.mxu1 %v2554_v22  ;;  %v414_v27 = vunpack.c.h.b16 %v66_v21 }
  0x50   :  { %1438 = vmatpush.bf16.msra.mxu2 %v2562_v8 }
  0x51   :  { %1128 = vmatmul.bf16.gmra.mxu0 %v2012_v44  ;;  %v2456_v44 = vld [vmem:[%s3556_s0 + $0xd4] sm:$0xf]  ;;  %1475 = vmatpush.bf16.msra.mxu3 %v2566_v56 }
  0x52   :  { %1161 = vmatmul.bf16.gmra.mxu1 %v2016_v45  ;;  %1373 = vmatpush.bf16.msra.mxu0 %v2545_v25  ;;  %v1981_v45 = vld [vmem:[%s3556_s0 + $0x100] sm:$0xf0] }
  0x53   :  { %1194 = vmatmul.bf16.gmra.mxu2 %v2020_v46  ;;  %1406 = vmatpush.bf16.msra.mxu1 %v2553_v26  ;;  %v1987_v46 = vld [vmem:[%s3556_s0 + $0xd8] sm:$0xf]  ;;  %v1984_v51 = vor.u32 %v2456_v44, %v1981_v45  ;;  %v413_v26 = vunpack.c.l.b16 %v66_v21 }
  0x54   :  { %1227 = vmatmul.bf16.gmra.mxu3 %v2024_v47  ;;  %1439 = vmatpush.bf16.msra.mxu2 %v2561_v23  ;;  %v2463_v47 = vld [vmem:[%s3556_s0 + $0x104] sm:$0xf0] }
  0x55   :  { %v1988_v52 = vor.u32 %v2463_v47, %v1987_v46 }
  0x56   :  { %1374 = vmatpush.bf16.msra.mxu0 %v2544_v40 }
  0x57   :  { %1407 = vmatpush.bf16.msra.mxu1 %v2552_v43 }
  0x58   :  { %1440 = vmatpush.bf16.msra.mxu2 %v2560_v39 }
  0x5a   :  { %1375 = vmatpush.bf16.msra.mxu0 %v2543_v55  ;;  %v1909_v55 = vld [vmem:[%s3556_s0 + $0x58] sm:$0xf0] }
  0x5b   :  { %1408 = vmatpush.bf16.msra.mxu1 %v2551_v57 }
  0x5c   :  { %1441 = vmatpush.bf16.msra.mxu2 %v2559_v54  ;;  %v2435_v54 = vld [vmem:[%s3556_s0 + $0x2c] sm:$0xf] }
  0x5e   :  { %1376 = vmatpush.bf16.msra.mxu0 %v2542_v62 }
  0x5f   :  { %1409 = vmatpush.bf16.msra.mxu1 %v2550_v63 }
  0x60   :  { %1442 = vmatpush.bf16.msra.mxu2 %v2558_v61 }
  0x61   :  { %1133 = vmatmul.bf16.gmra.mxu0 %v467_v0  ;;  %v2468_v0 = vld [vmem:[%s3556_s0 + $0x134] sm:$0xf] }
  0x62   :  { %1166 = vmatmul.bf16.gmra.mxu1 %v468_v1  ;;  %v2029_v1 = vld [vmem:[%s3556_s0 + $0x160] sm:$0xf0] }
  0x63   :  { %1199 = vmatmul.bf16.gmra.mxu2 %v469_v2  ;;  %v2035_v2 = vld [vmem:[%s3556_s0 + $0x138] sm:$0xf]  ;;  %v2032_v7 = vor.u32 %v2468_v0, %v2029_v1  ;;  %v1912_v1 = vor.u32 %v2435_v54, %v1909_v55 }
  0x64   :  { %1232 = vmatmul.bf16.gmra.mxu3 %v470_v3  ;;  %v2475_v3 = vld [vmem:[%s3556_s0 + $0x164] sm:$0xf0] }
  0x65   :  { %v2036_v10 = vor.u32 %v2475_v3, %v2035_v2 }
  0x71   :  { %1245 = vmatmul.bf16.vlgmr.msrb.gmra.mxu0 %v1884_v17 }
  0x72   :  { %1278 = vmatmul.bf16.vlgmr.msrb.gmra.mxu1 %v1888_v18 }
  0x73   :  { %1311 = vmatmul.bf16.vlgmr.msrb.gmra.mxu2 %v1892_v19  ;;  %v65_v19 = vld [vmem:[%s3556_s0 + $0x190] sm:$0xff] }
  0x74   :  { %1344 = vmatmul.bf16.vlgmr.msrb.gmra.mxu3 %v1896_v20  ;;  %v411_v24 = vunpack.c.l.b16 %v65_v19  ;;  %v412_v25 = vunpack.c.h.b16 %v65_v19  ;;  %v2447_v19 = vld [vmem:[%s3556_s0 + $0x8c] sm:$0xf] }
  0x76   :  { %v471_v30 = vpack.c.b16 %v411_v24, %v411_v24  ;;  %v472_v31 = vpack.c.b16 %v412_v25, %v412_v25 }
  0x81   :  { %1250 = vmatmul.bf16.gmra.mxu0 %v1932_v35  ;;  %v473_v35 = vpack.c.b16 %v413_v26, %v413_v26 }
  0x82   :  { %1283 = vmatmul.bf16.gmra.mxu1 %v1936_v36  ;;  %v474_v36 = vpack.c.b16 %v414_v27, %v414_v27 }
  0x83   :  { %1316 = vmatmul.bf16.gmra.mxu2 %v1940_v37 }
  0x84   :  { %1349 = vmatmul.bf16.gmra.mxu3 %v1944_v38 }
  0x91   :  { %1255 = vmatmul.bf16.gmra.mxu0 %v1980_v50  ;;  %v2434_v50 = vld [vmem:[%s3556_s0 + $0x24] sm:$0xf] }
  0x92   :  { %1288 = vmatmul.bf16.gmra.mxu1 %v1984_v51  ;;  %v1901_v51 = vld [vmem:[%s3556_s0 + $0x50] sm:$0xf0] }
  0x93   :  { %1321 = vmatmul.bf16.gmra.mxu2 %v1988_v52  ;;  %v1907_v52 = vld [vmem:[%s3556_s0 + $0x28] sm:$0xf]  ;;  %v1904_v59 = vor.u32 %v2434_v50, %v1901_v51  ;;  %v2459_v50 = vld [vmem:[%s3556_s0 + $0xec] sm:$0xf]  ;;  %v2005_v51 = vld [vmem:[%s3556_s0 + $0x118] sm:$0xf0] }
  0x94   :  { %1354 = vmatmul.bf16.gmra.mxu3 %v1992_v53  ;;  %v2441_v53 = vld [vmem:[%s3556_s0 + $0x54] sm:$0xf0] }
  0x95   :  { %v1908_v0 = vor.u32 %v2441_v53, %v1907_v52 }
  0x9e   :  { %v1114_v8 = vpop.f32.mrf.mxu0 }
  0x9f   :  { %v1147_v9 = vpop.f32.mrf.mxu1  ;;  %v1115_v12 = vadd.f32 %v3080_v60, %v1114_v8 }
  0xa1   :  { %v1148_v13 = vadd.f32 %v1147_v9, %v1115_v12  ;;  %1260 = vmatmul.bf16.gmra.mxu0 %v2028_v6 }
  0xa2   :  { %1293 = vmatmul.bf16.gmra.mxu1 %v2032_v7 }
  0xa3   :  { %1326 = vmatmul.bf16.gmra.mxu2 %v2036_v10 }
  0xa4   :  { %1359 = vmatmul.bf16.gmra.mxu3 %v2040_v11 }
  0xa6   :  { %v1180_v14 = vpop.f32.mrf.mxu2  ;;  %v1116_v17 = vpop.f32.mrf.mxu0 }
  0xa7   :  { %v1213_v15 = vpop.f32.mrf.mxu3  ;;  %v1181_v16 = vadd.f32 %v1180_v14, %v1148_v13  ;;  %v1149_v18 = vpop.f32.mrf.mxu1  ;;  %v1117_v20 = vadd.f32 %v3080_v60, %v1116_v17  ;;  %v1947_v13 = vld [vmem:[%s3556_s0 + $0x80] sm:$0xf]  ;;  %v2452_v14 = vld [vmem:[%s3556_s0 + $0xac] sm:$0xf0]  ;;  %v1955_v17 = vld [vmem:[%s3556_s0 + $0x88] sm:$0xf] }
  0xa8   :  { %v1948_v24 = vor.u32 %v2452_v14, %v1947_v13  ;;  %v2477_v13 = vld [vmem:[%s3556_s0 + $0x174] sm:$0xf0]  ;;  %v2471_v14 = vld [vmem:[%s3556_s0 + $0x14c] sm:$0xf] }
  0xa9   :  { %v3117_v22 = vadd.f32 %v1213_v15, %v1181_v16  ;;  %v1150_v23 = vadd.f32 %v1149_v18, %v1117_v20  ;;  %v2446_v15 = vld [vmem:[%s3556_s0 + $0x84] sm:$0xf]  ;;  %v1949_v16 = vld [vmem:[%s3556_s0 + $0xb0] sm:$0xf0]  ;;  %v2453_v18 = vld [vmem:[%s3556_s0 + $0xb4] sm:$0xf0] }
  0xaa   :  { %v1957_v20 = vld [vmem:[%s3556_s0 + $0xb8] sm:$0xf0]  ;;  %v1952_v25 = vor.u32 %v2446_v15, %v1949_v16 }
  0xab   :  { %v2053_v15 = vld [vmem:[%s3556_s0 + $0x178] sm:$0xf0] }
  0xae   :  { %v1182_v28 = vpop.f32.mrf.mxu2  ;;  %v1119_v33 = vpop.f32.mrf.mxu0 }
  0xaf   :  { %v1215_v29 = vpop.f32.mrf.mxu3  ;;  %v1183_v32 = vadd.f32 %v1182_v28, %v1150_v23  ;;  %v1152_v34 = vpop.f32.mrf.mxu1  ;;  %v1120_v37 = vadd.f32 %v3080_v60, %v1119_v33 }
  0xb1   :  { %v3120_v38 = vadd.f32 %v1215_v29, %v1183_v32  ;;  %v1153_v39 = vadd.f32 %v1152_v34, %v1120_v37  ;;  %1265 = vmatmul.bf16.gmra.mxu0 %v471_v30  ;;  %v1956_v29 = vor.u32 %v2453_v18, %v1955_v17  ;;  %v1960_v30 = vor.u32 %v2447_v19, %v1957_v20 }
  0xb2   :  { %1298 = vmatmul.bf16.gmra.mxu1 %v472_v31 }
  0xb3   :  { %1331 = vmatmul.bf16.gmra.mxu2 %v473_v35 }
  0xb4   :  { %1364 = vmatmul.bf16.gmra.mxu3 %v474_v36 }
  0xb6   :  { %v1185_v40 = vpop.f32.mrf.mxu2  ;;  %v1121_v43 = vpop.f32.mrf.mxu0 }
  0xb7   :  { %v1218_v41 = vpop.f32.mrf.mxu3  ;;  %v1186_v42 = vadd.f32 %v1185_v40, %v1153_v39  ;;  %v1154_v44 = vpop.f32.mrf.mxu1  ;;  %v1122_v45 = vadd.f32 %v3080_v60, %v1121_v43  ;;  %v1995_v43 = vld [vmem:[%s3556_s0 + $0xe0] sm:$0xf] }
  0xb9   :  { %v3123_v46 = vadd.f32 %v1218_v41, %v1186_v42  ;;  %v1155_v47 = vadd.f32 %v1154_v44, %v1122_v45  ;;  %v2464_v44 = vld [vmem:[%s3556_s0 + $0x10c] sm:$0xf0]  ;;  %v2458_v45 = vld [vmem:[%s3556_s0 + $0xe4] sm:$0xf] }
  0xba   :  { %v1996_v54 = vor.u32 %v2464_v44, %v1995_v43 }
  0xbe   :  { %v1187_v56 = vpop.f32.mrf.mxu2  ;;  %v1124_v62 = vpop.f32.mrf.mxu0 }
  0xbf   :  { %v1220_v57 = vpop.f32.mrf.mxu3  ;;  %v1188_v61 = vadd.f32 %v1187_v56, %v1155_v47  ;;  %v1157_v63 = vpop.f32.mrf.mxu1  ;;  %v1125_v2 = vadd.f32 %v3080_v60, %v1124_v62  ;;  %v1997_v47 = vld [vmem:[%s3556_s0 + $0x110] sm:$0xf0] }
  0xc0   :  { %v2000_v55 = vor.u32 %v2458_v45, %v1997_v47 }
  0xc1   :  { %v3150_v3 = vadd.f32 %v1220_v57, %v1188_v61  ;;  %v1158_v4 = vadd.f32 %v1157_v63, %v1125_v2  ;;  %1377 = vmatmul.bf16.vlgmr.msra.gmra.mxu0 %v1900_v58  ;;  %v2008_v61 = vor.u32 %v2459_v50, %v2005_v51 }
  0xc2   :  { %1410 = vmatmul.bf16.vlgmr.msra.gmra.mxu1 %v1904_v59  ;;  %v2004_v59 = vor.u32 %v2465_v49, %v2003_v48 }
  0xc3   :  { %1443 = vmatmul.bf16.vlgmr.msra.gmra.mxu2 %v1908_v0 }
  0xc4   :  { %2425 = vmatmul.msk.bf16.vlgmr.msra.gmra.mxu3 %vm1085_vm1, %v1912_v1 }
  0xc6   :  { %v1190_v5 = vpop.f32.mrf.mxu2  ;;  %v1126_v8 = vpop.f32.mrf.mxu0 }
  0xc7   :  { %v1223_v6 = vpop.f32.mrf.mxu3  ;;  %v1191_v7 = vadd.f32 %v1190_v5, %v1158_v4  ;;  %v1159_v9 = vpop.f32.mrf.mxu1  ;;  %v1127_v10 = vadd.f32 %v3080_v60, %v1126_v8  ;;  %v2043_v8 = vld [vmem:[%s3556_s0 + $0x140] sm:$0xf] }
  0xc9   :  { %v3154_v11 = vadd.f32 %v1223_v6, %v1191_v7  ;;  %v1160_v12 = vadd.f32 %v1159_v9, %v1127_v10  ;;  %v2470_v9 = vld [vmem:[%s3556_s0 + $0x144] sm:$0xf]  ;;  %v2045_v10 = vld [vmem:[%s3556_s0 + $0x170] sm:$0xf0] }
  0xca   :  { %v2048_v19 = vor.u32 %v2470_v9, %v2045_v10 }
  0xce   :  { %v1192_v21 = vpop.f32.mrf.mxu2  ;;  %v1129_v27 = vpop.f32.mrf.mxu0 }
  0xcf   :  { %v1225_v23 = vpop.f32.mrf.mxu3  ;;  %v1193_v26 = vadd.f32 %v1192_v21, %v1160_v12  ;;  %v1162_v28 = vpop.f32.mrf.mxu1  ;;  %v1130_v31 = vadd.f32 %v3080_v60, %v1129_v27  ;;  %v2051_v12 = vld [vmem:[%s3556_s0 + $0x148] sm:$0xf] }
  0xd1   :  { %v3181_v32 = vadd.f32 %v1225_v23, %v1193_v26  ;;  %v1163_v33 = vadd.f32 %v1162_v28, %v1130_v31  ;;  %1382 = vmatmul.bf16.gmra.mxu0 %v1948_v24  ;;  %v2052_v23 = vor.u32 %v2477_v13, %v2051_v12  ;;  %v2056_v24 = vor.u32 %v2471_v14, %v2053_v15 }
  0xd2   :  { %1415 = vmatmul.bf16.gmra.mxu1 %v1952_v25 }
  0xd3   :  { %1448 = vmatmul.bf16.gmra.mxu2 %v1956_v29 }
  0xd4   :  { %2426 = vmatmul.msk.bf16.gmra.mxu3 %vm1085_vm1, %v1960_v30 }
  0xd6   :  { %v1195_v34 = vpop.f32.mrf.mxu2  ;;  %v1131_v37 = vpop.f32.mrf.mxu0 }
  0xd7   :  { %v1228_v35 = vpop.f32.mrf.mxu3  ;;  %v1196_v36 = vadd.f32 %v1195_v34, %v1163_v33  ;;  %v1164_v39 = vpop.f32.mrf.mxu1  ;;  %v1132_v40 = vadd.f32 %v3080_v60, %v1131_v37  ;;  %v67_v33 = vld [vmem:[%s3556_s0 + $0x1a0] sm:$0xff] }
  0xd8   :  { %v415_v37 = vunpack.c.l.b16 %v67_v33 }
  0xd9   :  { %v3185_v41 = vadd.f32 %v1228_v35, %v1196_v36  ;;  %v1165_v42 = vadd.f32 %v1164_v39, %v1132_v40  ;;  %v416_v39 = vunpack.c.h.b16 %v67_v33 }
  0xda   :  { %v475_v45 = vpack.c.b16 %v415_v37, %v415_v37 }
  0xdb   :  { %v476_v47 = vpack.c.b16 %v416_v39, %v416_v39 }
  0xde   :  { %v1197_v52 = vpop.f32.mrf.mxu2  ;;  %v1134_v57 = vpop.f32.mrf.mxu0 }
  0xdf   :  { %v1230_v53 = vpop.f32.mrf.mxu3  ;;  %v1198_v56 = vadd.f32 %v1197_v52, %v1165_v42  ;;  %v1167_v58 = vpop.f32.mrf.mxu1  ;;  %v1135_v62 = vadd.f32 %v3080_v60, %v1134_v57  ;;  %v2476_v60 = vld [vmem:[%s3556_s0 + $0x16c] sm:$0xf0] }
  0xe0   :  { %v2044_v18 = vor.u32 %v2476_v60, %v2043_v8 }
  0xe1   :  { %v3212_v63 = vadd.f32 %v1230_v53, %v1198_v56  ;;  %v1168_v0 = vadd.f32 %v1167_v58, %v1135_v62  ;;  %1387 = vmatmul.bf16.gmra.mxu0 %v1996_v54 }
  0xe2   :  { %1420 = vmatmul.bf16.gmra.mxu1 %v2000_v55 }
  0xe3   :  { %1453 = vmatmul.bf16.gmra.mxu2 %v2004_v59 }
  0xe4   :  { %2427 = vmatmul.msk.bf16.gmra.mxu3 %vm1085_vm1, %v2008_v61 }
  0xe6   :  { %v1200_v1 = vpop.f32.mrf.mxu2  ;;  %v1136_v5 = vpop.f32.mrf.mxu0 }
  0xe7   :  { %v1233_v2 = vpop.f32.mrf.mxu3  ;;  %v1201_v4 = vadd.f32 %v1200_v1, %v1168_v0  ;;  %v1169_v6 = vpop.f32.mrf.mxu1 }
  0xe9   :  { %v3215_v7 = vadd.f32 %v1233_v2, %v1201_v4 }
  0xee   :  { %v1202_v16 = vpop.f32.mrf.mxu2  ;;  %v1246_v20 = vpop.f32.mrf.mxu0 }
  0xef   :  { %v1235_v17 = vpop.f32.mrf.mxu3  ;;  %v1279_v21 = vpop.f32.mrf.mxu1  ;;  %v1247_v25 = vadd.f32 %v1246_v20, %v3117_v22  ;;  %v68_v22 = vld [vmem:[%s3556_s0 + $0x1a8] sm:$0xff] }
  0xf0   :  { %v417_v40 = vunpack.c.l.b16 %v68_v22  ;;  %v418_v42 = vunpack.c.h.b16 %v68_v22 }
  0xf1   :  { %v1280_v26 = vadd.f32 %v1279_v21, %v1247_v25  ;;  %1392 = vmatmul.bf16.gmra.mxu0 %v2044_v18 }
  0xf2   :  { %1425 = vmatmul.bf16.gmra.mxu1 %v2048_v19  ;;  %v477_v51 = vpack.c.b16 %v417_v40, %v417_v40 }
  0xf3   :  { %1458 = vmatmul.bf16.gmra.mxu2 %v2052_v23 }
  0xf4   :  { %2428 = vmatmul.msk.bf16.gmra.mxu3 %vm1085_vm1, %v2056_v24 }
  0xf6   :  { %v1312_v27 = vpop.f32.mrf.mxu2  ;;  %v1248_v30 = vpop.f32.mrf.mxu0 }
  0xf7   :  { %v1345_v28 = vpop.f32.mrf.mxu3  ;;  %v1313_v29 = vadd.f32 %v1312_v27, %v1280_v26  ;;  %v1281_v31 = vpop.f32.mrf.mxu1  ;;  %v1249_v34 = vadd.f32 %v1248_v30, %v3120_v38  ;;  %v478_v38 = vpack.c.b16 %v418_v42, %v418_v42 }
  0xf9   :  { %v3250_v35 = vadd.f32 %v1345_v28, %v1313_v29  ;;  %v1282_v36 = vadd.f32 %v1281_v31, %v1249_v34 }
  0xfe   :  { %v1314_v43 = vpop.f32.mrf.mxu2  ;;  %v1251_v49 = vpop.f32.mrf.mxu0 }
  0xff   :  { %v1347_v44 = vpop.f32.mrf.mxu3  ;;  %v1315_v48 = vadd.f32 %v1314_v43, %v1282_v36  ;;  %v1284_v50 = vpop.f32.mrf.mxu1  ;;  %v1252_v52 = vadd.f32 %v1251_v49, %v3123_v46 }
 0x101   :  { %v3253_v53 = vadd.f32 %v1347_v44, %v1315_v48  ;;  %v1285_v54 = vadd.f32 %v1284_v50, %v1252_v52  ;;  %1397 = vmatmul.bf16.gmra.mxu0 %v475_v45 }
 0x102   :  { %1430 = vmatmul.bf16.gmra.mxu1 %v476_v47 }
 0x103   :  { %1463 = vmatmul.bf16.gmra.mxu2 %v477_v51 }
 0x104   :  { %2429 = vmatmul.msk.bf16.gmra.mxu3 %vm1085_vm1, %v478_v38 }
 0x106   :  { %v1317_v55 = vpop.f32.mrf.mxu2  ;;  %v1253_v58 = vpop.f32.mrf.mxu0 }
 0x107   :  { %v1350_v56 = vpop.f32.mrf.mxu3  ;;  %v1318_v57 = vadd.f32 %v1317_v55, %v1285_v54  ;;  %v1286_v59 = vpop.f32.mrf.mxu1  ;;  %v1254_v61 = vadd.f32 %v1253_v58, %v3150_v3 }
 0x109   :  { %v3257_v62 = vadd.f32 %v1350_v56, %v1318_v57  ;;  %v1287_v0 = vadd.f32 %v1286_v59, %v1254_v61 }
 0x10e   :  { %v1319_v1 = vpop.f32.mrf.mxu2  ;;  %v1256_v4 = vpop.f32.mrf.mxu0 }
 0x10f   :  { %v1352_v46 = vpop.f32.mrf.mxu3  ;;  %v1320_v2 = vadd.f32 %v1319_v1, %v1287_v0  ;;  %v1289_v5 = vpop.f32.mrf.mxu1  ;;  %v1257_v6 = vadd.f32 %v1256_v4, %v3154_v11 }
 0x111   :  { %v3260_v8 = vadd.f32 %v1352_v46, %v1320_v2  ;;  %v1290_v60 = vadd.f32 %v1289_v5, %v1257_v6 }
 0x116   :  { %v1322_v9 = vpop.f32.mrf.mxu2  ;;  %v1258_v13 = vpop.f32.mrf.mxu0 }
 0x117   :  { %v1355_v10 = vpop.f32.mrf.mxu3  ;;  %v1323_v12 = vadd.f32 %v1322_v9, %v1290_v60  ;;  %v1291_v14 = vpop.f32.mrf.mxu1  ;;  %v1259_v3 = vadd.f32 %v1258_v13, %v3181_v32 }
 0x119   :  { %v3263_v15 = vadd.f32 %v1355_v10, %v1323_v12  ;;  %v1292_v16 = vadd.f32 %v1291_v14, %v1259_v3 }
 0x11e   :  { %v1324_v17 = vpop.f32.mrf.mxu2  ;;  %v1261_v20 = vpop.f32.mrf.mxu0 }
 0x11f   :  { %v1357_v18 = vpop.f32.mrf.mxu3  ;;  %v1325_v19 = vadd.f32 %v1324_v17, %v1292_v16  ;;  %v1294_v21 = vpop.f32.mrf.mxu1  ;;  %v1262_v11 = vadd.f32 %v1261_v20, %v3185_v41 }
 0x121   :  { %v3266_v23 = vadd.f32 %v1357_v18, %v1325_v19  ;;  %v1295_v24 = vadd.f32 %v1294_v21, %v1262_v11 }
 0x126   :  { %v1327_v25 = vpop.f32.mrf.mxu2  ;;  %v1263_v28 = vpop.f32.mrf.mxu0 }
 0x127   :  { %v1360_v26 = vpop.f32.mrf.mxu3  ;;  %v1328_v27 = vadd.f32 %v1327_v25, %v1295_v24  ;;  %v1296_v29 = vpop.f32.mrf.mxu1  ;;  %v1264_v32 = vadd.f32 %v1263_v28, %v3212_v63 }
 0x129   :  { %v3269_v30 = vadd.f32 %v1360_v26, %v1328_v27  ;;  %v1297_v31 = vadd.f32 %v1296_v29, %v1264_v32 }
 0x12e   :  { %v1329_v33 = vpop.f32.mrf.mxu2  ;;  %v1266_v36 = vpop.f32.mrf.mxu0 }
 0x12f   :  { %v1362_v34 = vpop.f32.mrf.mxu3  ;;  %v1330_v22 = vadd.f32 %v1329_v33, %v1297_v31  ;;  %v1299_v37 = vpop.f32.mrf.mxu1  ;;  %v1267_v41 = vadd.f32 %v1266_v36, %v3215_v7 }
 0x131   :  { %v3272_v39 = vadd.f32 %v1362_v34, %v1330_v22  ;;  %v1300_v40 = vadd.f32 %v1299_v37, %v1267_v41 }
 0x136   :  { %v1332_v42 = vpop.f32.mrf.mxu2  ;;  %v1268_v45 = vpop.f32.mrf.mxu0 }
 0x137   :  { %v1365_v43 = vpop.f32.mrf.mxu3  ;;  %v1333_v44 = vadd.f32 %v1332_v42, %v1300_v40  ;;  %v1301_v47 = vpop.f32.mrf.mxu1 }
 0x139   :  { %v3274_v48 = vadd.f32 %v1365_v43, %v1333_v44 }
 0x13e   :  { %v1334_v63 = vpop.f32.mrf.mxu2  ;;  %v1378_v50 = vpop.f32.mrf.mxu0 }
 0x13f   :  { %v1367_v49 = vpop.f32.mrf.mxu3  ;;  %v1411_v51 = vpop.f32.mrf.mxu1  ;;  %v1379_v38 = vadd.f32 %v1378_v50, %v3250_v35 }
 0x141   :  { %v1412_v52 = vadd.f32 %v1411_v51, %v1379_v38 }
 0x146   :  { %v1444_v54 = vpop.f32.mrf.mxu2  ;;  %v1380_v56 = vpop.f32.mrf.mxu0 }
 0x147   :  { %v1477_v55 = vpop.f32.mrf.mxu3  ;;  %v1445_v7 = vadd.f32 %v1444_v54, %v1412_v52  ;;  %v1413_v57 = vpop.f32.mrf.mxu1  ;;  %v1381_v59 = vadd.f32 %v1380_v56, %v3253_v53 }
 0x149   :  { %v1478_v58 = vadd.f32 %v1477_v55, %v1445_v7  ;;  %v1414_v1 = vadd.f32 %v1413_v57, %v1381_v59 }
 0x14b   :  { %v3278_v61 = vmul.f32 0.70710677, %v1478_v58  ;;  %v3311_v54 = vmul.f32 0.5, %v1478_v58 }
 0x14d   :  { %v1519_v0 = vand.u32 2147483647, %v3278_v61  ;;  %vm1807_vm14 = vcmp.ge.f32.partialorder %v3278_v61, 0.0 }
 0x14e   :  { %v1446_v46 = vpop.f32.mrf.mxu2  ;;  %v1383_v6 = vpop.f32.mrf.mxu0 }
 0x14f   :  { %v1479_v2 = vpop.f32.mrf.mxu3  ;;  %v1528_v4 = vmul.f32 0.3275911, %v1519_v0  ;;  %v1447_v5 = vadd.f32 %v1446_v46, %v1414_v1  ;;  %v1416_v35 = vpop.f32.mrf.mxu1  ;;  %v1384_v10 = vadd.f32 %v1383_v6, %v3257_v62  ;;  %v1753_v27 = vsub.f32 0.0, %v1519_v0 }
 0x151   :  { %v1537_v60 = vadd.f32 1.0, %v1528_v4  ;;  %v1480_v9 = vadd.f32 %v1479_v2, %v1447_v5  ;;  %v1417_v13 = vadd.f32 %v1416_v35, %v1384_v10  ;;  %v1762_v40 = vmul.f32 %v1753_v27, %v1519_v0 }
 0x153   :  { %2571 = vrcp.f32 %v1537_v60  ;;  %v3282_v12 = vmul.f32 0.70710677, %v1480_v9  ;;  %v1557_v28 = vand.u32 2147483648, %v1537_v60  ;;  %v1555_v31 = vand.u32 2147483647, %v1537_v60 }
 0x154   :  { %vm1551_vm3 = vweird.f32 %v1537_v60  ;;  %v1771_v52 = vmul.f32 1.442695, %v1762_v40  ;;  %v3313_v55 = vmul.f32 0.5, %v1480_v9 }
 0x155   :  { %v3285_v53 = vand.u32 2147483647, %v3282_v12  ;;  %v1558_v43 = vor.u32 1.1754944e-38, %v1557_v28  ;;  %vm1556_vm5 = vcmp.eq.f32.partialorder %v1555_v31, 8.507059e+37 }
 0x156   :  { %v1449_v14 = vpop.f32.mrf.mxu2  ;;  %v1385_v17 = vpop.f32.mrf.mxu0 }
 0x157   :  { %v1482_v3 = vpop.f32.mrf.mxu3  ;;  %v1450_v16 = vadd.f32 %v1449_v14, %v1417_v13  ;;  %v1418_v18 = vpop.f32.mrf.mxu1  ;;  %v1529_v19 = vmul.f32 0.3275911, %v3285_v53  ;;  %v1386_v62 = vadd.f32 %v1385_v17, %v3260_v8  ;;  %v1754_v59 = vsub.f32 0.0, %v3285_v53 }
 0x159   :  { %v2572_v20 = vpop.eup %2571  ;;  %v3288_v21 = vadd.f32 %v1482_v3, %v1450_v16  ;;  %v3290_v24 = vadd.f32 1.0, %v1529_v19  ;;  %v1419_v33 = vadd.f32 %v1418_v18, %v1386_v62  ;;  %v1763_v18 = vmul.f32 %v1754_v59, %v3285_v53 }
 0x15a   :  { %v1547_v11 = vmul.f32 %v2572_v20, %v1537_v60  ;;  %vm1552_vm2 = vweird.f32 %v2572_v20 }
 0x15b   :  { %v3294_v25 = vmul.f32 0.70710677, %v3288_v21  ;;  %2573 = vrcp.f32 %v3290_v24  ;;  %vm1553_vm4 = vmor %vm1551_vm3, %vm1552_vm2  ;;  %v1569_v4 = vand.u32 2147483647, %v3290_v24  ;;  %vm1565_vm7 = vweird.f32 %v3290_v24 }
 0x15c   :  { %v1548_v26 = vsub.f32 1.0, %v1547_v11  ;;  %vm1808_vm3 = vcmp.ge.f32.partialorder %v3282_v12, 0.0 }
 0x15d   :  { %v3298_v29 = vand.u32 2147483647, %v3294_v25  ;;  %vm1570_vm9 = vcmp.eq.f32.partialorder %v1569_v4, 8.507059e+37 }
 0x15e   :  { %v1549_v32 = vmul.f32 %v2572_v20, %v1548_v26  ;;  %v1451_v34 = vpop.f32.mrf.mxu2  ;;  %v1388_v8 = vpop.f32.mrf.mxu0 }
 0x15f   :  { %v1484_v22 = vpop.f32.mrf.mxu3  ;;  %v1530_v36 = vmul.f32 0.3275911, %v3298_v29  ;;  %v1421_v37 = vpop.f32.mrf.mxu1  ;;  %v1452_v42 = vadd.f32 %v1451_v34, %v1419_v33  ;;  %v1389_v49 = vadd.f32 %v1388_v8, %v3263_v15  ;;  %v1571_v15 = vand.u32 2147483648, %v3290_v24 }
 0x160   :  { %v1550_v41 = vadd.f32 %v2572_v20, %v1549_v32  ;;  %v1755_v60 = vsub.f32 0.0, %v3298_v29 }
 0x161   :  { %v3301_v44 = vadd.f32 1.0, %v1530_v36  ;;  %v2574_v45 = vpop.eup %2573  ;;  %v3303_v63 = vadd.f32 %v1484_v22, %v1452_v42  ;;  %v1422_v0 = vadd.f32 %v1421_v37, %v1389_v49  ;;  %v1572_v17 = vor.u32 1.1754944e-38, %v1571_v15 }
 0x162   :  { %v1554_v47 = vsel %vm1553_vm4, %v2572_v20, %v1550_v41  ;;  %v1561_v51 = vmul.f32 %v2574_v45, %v3290_v24  ;;  %vm1566_vm6 = vweird.f32 %v2574_v45  ;;  %v1773_v41 = vmul.f32 1.442695, %v1763_v18 }
 0x163   :  { %v3306_v50 = vsel %vm1556_vm5, %v1558_v43, %v1554_v47  ;;  %2575 = vrcp.f32 %v3301_v44  ;;  %v3316_v56 = vmul.f32 0.70710677, %v3303_v63  ;;  %vm1567_vm8 = vmor %vm1565_vm7, %vm1566_vm6  ;;  %v1585_v32 = vand.u32 2147483648, %v3301_v44 }
 0x164   :  { %v1672_v38 = vmul.f32 1.0614054, %v3306_v50  ;;  %v1562_v7 = vsub.f32 1.0, %v1561_v51  ;;  %2577 = vpow2.f32 %v1771_v52  ;;  %v1583_v22 = vand.u32 2147483647, %v3301_v44 }
 0x165   :  { %v3322_v58 = vand.u32 2147483647, %v3316_v56  ;;  %vm1579_vm11 = vweird.f32 %v3301_v44  ;;  %vm1809_vm6 = vcmp.ge.f32.partialorder %v3294_v25, 0.0 }
 0x166   :  { %v1681_v57 = vadd.f32 -1.4531521, %v1672_v38  ;;  %v1454_v1 = vpop.f32.mrf.mxu2  ;;  %v1563_v2 = vmul.f32 %v2574_v45, %v1562_v7  ;;  %v1390_v5 = vpop.f32.mrf.mxu0  ;;  %v1586_v38 = vor.u32 1.1754944e-38, %v1585_v32  ;;  %vm1584_vm13 = vcmp.eq.f32.partialorder %v1583_v22, 8.507059e+37 }
 0x167   :  { %v1487_v46 = vpop.f32.mrf.mxu3  ;;  %v1423_v6 = vpop.f32.mrf.mxu1  ;;  %v1455_v9 = vadd.f32 %v1454_v1, %v1422_v0  ;;  %v1531_v14 = vmul.f32 0.3275911, %v3322_v58  ;;  %v1391_v3 = vadd.f32 %v1390_v5, %v3266_v23  ;;  %v1764_v23 = vmul.f32 %v1755_v60, %v3298_v29 }
 0x168   :  { %v1690_v35 = vmul.f32 %v1681_v57, %v3306_v50  ;;  %v1564_v13 = vadd.f32 %v2574_v45, %v1563_v2  ;;  %v1756_v52 = vsub.f32 0.0, %v3322_v58  ;;  %v3363_v1 = vmul.f32 0.5, %v3288_v21 }
 0x169   :  { %v2576_v10 = vpop.eup %2575  ;;  %v3332_v11 = vadd.f32 1.0, %v1531_v14  ;;  %v3334_v62 = vadd.f32 %v1487_v46, %v1455_v9  ;;  %v1424_v53 = vadd.f32 %v1423_v6, %v1391_v3  ;;  %v1775_v49 = vmul.f32 1.442695, %v1764_v23 }
 0x16a   :  { %v1699_v16 = vadd.f32 1.4214138, %v1690_v35  ;;  %v1575_v19 = vmul.f32 %v2576_v10, %v3301_v44  ;;  %v1568_v20 = vsel %vm1567_vm8, %v2574_v45, %v1564_v13  ;;  %v2578_v31 = vpop.eup %2577  ;;  %vm1580_vm10 = vweird.f32 %v2576_v10 }
 0x16b   :  { %v3337_v26 = vsel %vm1570_vm9, %v1572_v17, %v1568_v20  ;;  %2579 = vrcp.f32 %v3332_v11  ;;  %v3345_v40 = vmul.f32 0.70710677, %v3334_v62  ;;  %vm1581_vm12 = vmor %vm1579_vm11, %vm1580_vm10  ;;  %v1765_v60 = vmul.f32 %v1756_v52, %v3322_v58 }
 0x16c   :  { %v1708_v24 = vmul.f32 %v1699_v16, %v3306_v50  ;;  %v1576_v27 = vsub.f32 1.0, %v1575_v19  ;;  %v1673_v28 = vmul.f32 1.0614054, %v3337_v26  ;;  %2581 = vpow2.f32 %v1773_v41 }
 0x16d   :  { %v3357_v7 = vand.u32 2147483647, %v3345_v40  ;;  %2583 = vpow2.f32 %v1775_v49  ;;  %v1597_v17 = vand.u32 2147483647, %v3332_v11  ;;  %v1599_v18 = vand.u32 2147483648, %v3332_v11 }
 0x16e   :  { %v1717_v33 = vadd.f32 -0.28449672, %v1708_v24  ;;  %v1577_v34 = vmul.f32 %v2576_v10, %v1576_v27  ;;  %v1456_v36 = vpop.f32.mrf.mxu2  ;;  %v1682_v37 = vadd.f32 -1.4531521, %v1673_v28  ;;  %v3347_v42 = vpop.f32.mrf.mxu0  ;;  %vm1593_vm0 = vweird.f32 %v3332_v11 }
 0x16f   :  { %v1489_v8 = vpop.f32.mrf.mxu3  ;;  %v1457_v29 = vadd.f32 %v1456_v36, %v1424_v53  ;;  %v3349_v43 = vpop.f32.mrf.mxu1  ;;  %v1532_v2 = vmul.f32 0.3275911, %v3357_v7  ;;  %v1777_v28 = vmul.f32 1.442695, %v1765_v60  ;;  %v1757_v22 = vsub.f32 0.0, %v3357_v7 }
 0x170   :  { %v1726_v45 = vmul.f32 %v1717_v33, %v3306_v50  ;;  %v1578_v47 = vadd.f32 %v2576_v10, %v1577_v34  ;;  %v1691_v51 = vmul.f32 %v1682_v37, %v3337_v26  ;;  %vm1598_vm2 = vcmp.eq.f32.partialorder %v1597_v17, 8.507059e+37 }
 0x171   :  { %v3359_v59 = vadd.f32 %v1489_v8, %v1457_v29  ;;  %v2580_v0 = vpop.eup %2579  ;;  %v3373_v9 = vadd.f32 1.0, %v1532_v2  ;;  %v1600_v37 = vor.u32 1.1754944e-38, %v1599_v18  ;;  %v1766_v2 = vmul.f32 %v1757_v22, %v3357_v7 }
 0x172   :  { %v1735_v57 = vadd.f32 0.2548296, %v1726_v45  ;;  %v1582_v15 = vsel %vm1581_vm12, %v2576_v10, %v1578_v47  ;;  %v1700_v44 = vadd.f32 1.4214138, %v1691_v51  ;;  %v1589_v6 = vmul.f32 %v2580_v0, %v3332_v11  ;;  %v2582_v53 = vpop.eup %2581 }
 0x173   :  { %v3365_v46 = vsel %vm1584_vm13, %v1586_v38, %v1582_v15  ;;  %v3376_v14 = vmul.f32 0.70710677, %v3359_v59  ;;  %2585 = vrcp.f32 %v3373_v9  ;;  %vm1594_vm15 = vweird.f32 %v2580_v0  ;;  %v2584_v36 = vpop.eup %2583 }
 0x174   :  { %v1744_v4 = vmul.f32 %v1735_v57, %v3306_v50  ;;  %v1674_v5 = vmul.f32 1.0614054, %v3365_v46  ;;  %v1709_v35 = vmul.f32 %v1700_v44, %v3337_v26  ;;  %v1590_v13 = vsub.f32 1.0, %v1589_v6  ;;  %vm1595_vm1 = vmor %vm1593_vm0, %vm1594_vm15 }
 0x175   :  { %v3393_v32 = vand.u32 2147483647, %v3376_v14  ;;  %v1394_v47 = vadd.f32 %v3347_v42, %v3269_v30  ;;  %vm1607_vm4 = vweird.f32 %v3373_v9  ;;  %vm1810_vm13 = vcmp.ge.f32.partialorder %v3316_v56, 0.0 }
 0x176   :  { %v1789_v21 = vmul.f32 %v2578_v31, %v1744_v4  ;;  %v1683_v10 = vadd.f32 -1.4531521, %v1674_v5  ;;  %v3378_v3 = vpop.f32.mrf.mxu2  ;;  %v1718_v16 = vadd.f32 -0.28449672, %v1709_v35  ;;  %v3385_v58 = vpop.f32.mrf.mxu0  ;;  %v1591_v27 = vmul.f32 %v2580_v0, %v1590_v13 }
 0x177   :  { %v3380_v50 = vpop.f32.mrf.mxu3  ;;  %v3387_v19 = vpop.f32.mrf.mxu1  ;;  %v1533_v41 = vmul.f32 0.3275911, %v3393_v32  ;;  %vm1811_vm15 = vcmp.ge.f32.partialorder %v3345_v40, 0.0 }
 0x178   :  { %v1798_v20 = vsub.f32 1.0, %v1789_v21  ;;  %v1692_v24 = vmul.f32 %v1683_v10, %v3365_v46  ;;  %v1727_v23 = vmul.f32 %v1718_v16, %v3337_v26  ;;  %v1592_v34 = vadd.f32 %v2580_v0, %v1591_v27 }
 0x179   :  { %v2586_v49 = vpop.eup %2585  ;;  %v3406_v57 = vadd.f32 1.0, %v1533_v41  ;;  %v1613_v10 = vand.u32 2147483648, %v3373_v9 }
 0x17a   :  { %v1816_v31 = vsub.f32 0.0, %v1798_v20  ;;  %v1701_v33 = vadd.f32 1.4214138, %v1692_v24  ;;  %v1736_v8 = vadd.f32 0.2548296, %v1727_v23  ;;  %v1596_v45 = vsel %vm1595_vm1, %v2580_v0, %v1592_v34 }
 0x17b   :  { %v3404_v52 = vsel %vm1598_vm2, %v1600_v37, %v1596_v45  ;;  %v1603_v44 = vmul.f32 %v2586_v49, %v3373_v9  ;;  %2587 = vrcp.f32 %v3406_v57  ;;  %vm1608_vm5 = vweird.f32 %v2586_v49 }
 0x17c   :  { %v1825_v11 = vsel %vm1807_vm14, %v1798_v20, %v1816_v31  ;;  %v1710_v29 = vmul.f32 %v1701_v33, %v3365_v46  ;;  %v1745_v38 = vmul.f32 %v1736_v8, %v3337_v26  ;;  %v1675_v61 = vmul.f32 1.0614054, %v3404_v52  ;;  %vm1609_vm8 = vmor %vm1607_vm4, %vm1608_vm5 }
 0x17d   :  { %v1834_v51 = vadd.f32 1.0, %v1825_v11  ;;  %v1611_v26 = vand.u32 2147483647, %v3373_v9  ;;  %v1604_v21 = vsub.f32 1.0, %v1603_v44  ;;  %2589 = vpow2.f32 %v1777_v28 }
 0x17e   :  { %v1719_v15 = vadd.f32 -0.28449672, %v1710_v29  ;;  %v3411_v4 = vpop.f32.mrf.mxu2  ;;  %v1790_v42 = vmul.f32 %v2582_v53, %v1745_v38  ;;  %v1398_v5 = vpop.f32.mrf.mxu0  ;;  %v1684_v60 = vadd.f32 -1.4531521, %v1675_v61  ;;  %v3431_v24 = vmul.f32 1.442695, %v1766_v2 }
 0x17f   :  { %v3413_v0 = vpop.f32.mrf.mxu3  ;;  %v1843_v30 = vmul.f32 %v1834_v51, %v3311_v54  ;;  %v1431_v6 = vpop.f32.mrf.mxu1  ;;  %v1427_v54 = vadd.f32 %v3349_v43, %v1394_v47  ;;  %v1605_v17 = vmul.f32 %v2586_v49, %v1604_v21  ;;  %vm3427_vm7 = vcmp.eq.f32.partialorder %v1611_v26, 8.507059e+37 }
 0x180   :  { %v1728_v35 = vmul.f32 %v1719_v15, %v3365_v46  ;;  %v1799_v7 = vsub.f32 1.0, %v1790_v42  ;;  %v1693_v16 = vmul.f32 %v1684_v60, %v3404_v52  ;;  %v1614_v53 = vor.u32 1.1754944e-38, %v1613_v10 }
 0x181   :  { %1852 = vst [vmem:[%s3557_s3] sm:$0xff] %v1843_v30  ;;  %v1460_v27 = vadd.f32 %v3378_v3, %v1427_v54  ;;  %v1606_v43 = vadd.f32 %v2586_v49, %v1605_v17  ;;  %v2588_v31 = vpop.eup %2587  ;;  %v1758_v34 = vsub.f32 0.0, %v3393_v32  ;;  %v1396_v3 = vadd.f32 %v3385_v58, %v3272_v39 }
 0x182   :  { %v1737_v13 = vadd.f32 0.2548296, %v1728_v35  ;;  %v1817_v18 = vsub.f32 0.0, %v1799_v7  ;;  %v1702_v28 = vadd.f32 1.4214138, %v1693_v16  ;;  %v1617_v45 = vmul.f32 %v2588_v31, %v3406_v57 }
 0x183   :  { %v3441_v22 = vadd.f32 %v3380_v50, %v1460_v27  ;;  %v1610_v41 = vsel %vm1609_vm8, %v2586_v49, %v1606_v43  ;;  %v2590_v12 = vpop.eup %2589  ;;  %v1625_v50 = vand.u32 2147483647, %v3406_v57  ;;  %v1399_v47 = vadd.f32 %v1398_v5, %v3274_v48 }
 0x184   :  { %v1746_v23 = vmul.f32 %v1737_v13, %v3365_v46  ;;  %v1826_v33 = vsel %vm1808_vm3, %v1799_v7, %v1817_v18  ;;  %v1711_v37 = vmul.f32 %v1702_v28, %v3404_v52  ;;  %v3448_v9 = vsel %vm3427_vm7, %v1614_v53, %v1610_v41 }
 0x185   :  { %v1835_v8 = vadd.f32 1.0, %v1826_v33  ;;  %v1676_v49 = vmul.f32 1.0614054, %v3448_v9  ;;  %v1618_v15 = vsub.f32 1.0, %v1617_v45  ;;  %v1627_v61 = vand.u32 2147483648, %v3406_v57 }
 0x186   :  { %v1791_v46 = vmul.f32 %v2584_v36, %v1746_v23  ;;  %v1464_v11 = vpop.f32.mrf.mxu2  ;;  %v1400_v51 = vpop.f32.mrf.mxu0  ;;  %v1720_v38 = vadd.f32 -0.28449672, %v1711_v37  ;;  %v3457_v44 = vmul.f32 0.70710677, %v3441_v22  ;;  %v1429_v2 = vadd.f32 %v3387_v19, %v1396_v3 }
 0x187   :  { %v1497_v29 = vpop.f32.mrf.mxu3  ;;  %v1433_v39 = vpop.f32.mrf.mxu1  ;;  %v1844_v58 = vmul.f32 %v1835_v8, %v3313_v55  ;;  %v1685_v55 = vadd.f32 -1.4531521, %v1676_v49  ;;  %vm1622_vm9 = vweird.f32 %v2588_v31  ;;  %v1619_v42 = vmul.f32 %v2588_v31, %v1618_v15 }
 0x188   :  { %v1800_v36 = vsub.f32 1.0, %v1791_v46  ;;  %v1729_v30 = vmul.f32 %v1720_v38, %v3404_v52  ;;  %v3465_v26 = vand.u32 2147483647, %v3457_v44  ;;  %v1462_v5 = vadd.f32 %v3411_v4, %v1429_v2 }
 0x189   :  { %1853 = vst [vmem:[%s3557_s3 + $0x8] sm:$0xff] %v1844_v58  ;;  %v1432_v35 = vadd.f32 %v1431_v6, %v1399_v47  ;;  %v1694_v21 = vmul.f32 %v1685_v55, %v3448_v9  ;;  %vm1621_vm10 = vweird.f32 %v3406_v57  ;;  %v1620_v7 = vadd.f32 %v2588_v31, %v1619_v42 }
 0x18a   :  { %v1818_v48 = vsub.f32 0.0, %v1800_v36  ;;  %v1738_v19 = vadd.f32 0.2548296, %v1729_v30  ;;  %v1534_v54 = vmul.f32 0.3275911, %v3465_v26  ;;  %vm1623_vm11 = vmor %vm1621_vm10, %vm1622_vm9  ;;  %vm1626_vm12 = vcmp.eq.f32.partialorder %v1625_v50, 8.507059e+37 }
 0x18b   :  { %v1465_v13 = vadd.f32 %v1464_v11, %v1432_v35  ;;  %v1703_v17 = vadd.f32 1.4214138, %v1694_v21  ;;  %v1628_v4 = vor.u32 1.1754944e-38, %v1627_v61  ;;  %v1624_v20 = vsel %vm1623_vm11, %v2588_v31, %v1620_v7 }
 0x18c   :  { %v1827_v60 = vsel %vm1809_vm6, %v1800_v36, %v1818_v48  ;;  %v1747_v16 = vmul.f32 %v1738_v19, %v3404_v52  ;;  %v3476_v27 = vadd.f32 1.0, %v1534_v54  ;;  %v3479_v57 = vadd.f32 %v3413_v0, %v1462_v5 }
 0x18d   :  { %v1836_v10 = vadd.f32 1.0, %v1827_v60  ;;  %v1712_v28 = vmul.f32 %v1703_v17, %v3448_v9  ;;  %v1629_v43 = vsel %vm1626_vm12, %v1628_v4, %v1624_v20  ;;  %v3486_v53 = vadd.f32 %v1497_v29, %v1465_v13 }
 0x18e   :  { %v1466_v6 = vpop.f32.mrf.mxu2  ;;  %v1792_v23 = vmul.f32 %v2590_v12, %v1747_v16  ;;  %v1677_v52 = vmul.f32 1.0614054, %v1629_v43  ;;  %2591 = vrcp.f32 %v3476_v27  ;;  %v1767_v33 = vmul.f32 %v1758_v34, %v3393_v32 }
 0x18f   :  { %v1499_v25 = vpop.f32.mrf.mxu3  ;;  %v1845_v18 = vmul.f32 %v1836_v10, %v3363_v1  ;;  %v1721_v31 = vadd.f32 -0.28449672, %v1712_v28  ;;  %2593 = vpow2.f32 %v3431_v24  ;;  %v3491_v3 = vmul.f32 0.70710677, %v3479_v57 }
 0x190   :  { %v1801_v1 = vsub.f32 1.0, %v1792_v23  ;;  %v1686_v0 = vadd.f32 -1.4531521, %v1677_v52  ;;  %v3499_v11 = vmul.f32 0.70710677, %v3486_v53  ;;  %v1504_v12 = vmul.f32 0.5, %v3303_v63 }
 0x191   :  { %1854 = vst [vmem:[%s3557_s3 + $0x10] sm:$0xff] %v1845_v18  ;;  %v1730_v46 = vmul.f32 %v1721_v31, %v3448_v9  ;;  %v3496_v41 = vand.u32 2147483647, %v3491_v3  ;;  %v1781_v34 = vmul.f32 1.442695, %v1767_v33  ;;  %vm1635_vm0 = vweird.f32 %v3476_v27 }
 0x192   :  { %v1819_v8 = vsub.f32 0.0, %v1801_v1  ;;  %v1695_v37 = vmul.f32 %v1686_v0, %v1629_v43  ;;  %v3506_v39 = vand.u32 2147483647, %v3499_v11  ;;  %v1639_v55 = vand.u32 2147483647, %v3476_v27 }
 0x193   :  { %v1739_v32 = vadd.f32 0.2548296, %v1730_v46  ;;  %v1535_v47 = vmul.f32 0.3275911, %v3496_v41  ;;  %2595 = vpow2.f32 %v1781_v34  ;;  %v1759_v10 = vsub.f32 0.0, %v3465_v26 }
 0x194   :  { %v1828_v29 = vsel %vm1810_vm13, %v1801_v1, %v1819_v8  ;;  %v2592_v24 = vpop.eup %2591  ;;  %v1704_v50 = vadd.f32 1.4214138, %v1695_v37  ;;  %v1536_v63 = vmul.f32 0.3275911, %v3506_v39  ;;  %vm1640_vm2 = vcmp.eq.f32.partialorder %v1639_v55, 8.507059e+37 }
 0x195   :  { %v1837_v45 = vadd.f32 1.0, %v1828_v29  ;;  %v1748_v51 = vmul.f32 %v1739_v32, %v3448_v9  ;;  %v1631_v56 = vmul.f32 %v2592_v24, %v3476_v27  ;;  %v2594_v58 = vpop.eup %2593  ;;  %v1544_v49 = vadd.f32 1.0, %v1535_v47 }
 0x196   :  { %v1713_v38 = vmul.f32 %v1704_v50, %v1629_v43  ;;  %v1641_v9 = vand.u32 2147483648, %v3476_v27  ;;  %vm1636_vm14 = vweird.f32 %v2592_v24  ;;  %v3514_v5 = vadd.f32 1.0, %v1536_v63 }
 0x197   :  { %v1846_v36 = vmul.f32 %v1837_v45, %v1504_v12  ;;  %v1793_v15 = vmul.f32 %v2594_v58, %v1748_v51  ;;  %v1632_v61 = vsub.f32 1.0, %v1631_v56  ;;  %2597 = vrcp.f32 %v1544_v49  ;;  %vm1637_vm1 = vmor %vm1635_vm0, %vm1636_vm14 }
 0x198   :  { %v1722_v2 = vadd.f32 -0.28449672, %v1713_v38  ;;  %v1642_v21 = vor.u32 1.1754944e-38, %v1641_v9  ;;  %2599 = vrcp.f32 %v3514_v5  ;;  %v1505_v17 = vmul.f32 0.5, %v3334_v62 }
 0x199   :  { %1855 = vst [vmem:[%s3557_s3 + $0x18] sm:$0xff] %v1846_v36  ;;  %v1802_v48 = vsub.f32 1.0, %v1793_v15  ;;  %v1633_v30 = vmul.f32 %v2592_v24, %v1632_v61  ;;  %v2596_v7 = vpop.eup %2595  ;;  %v1768_v23 = vmul.f32 %v1759_v10, %v3465_v26  ;;  %v1653_v28 = vand.u32 2147483647, %v1544_v49 }
 0x19a   :  { %v1731_v42 = vmul.f32 %v1722_v2, %v1629_v43  ;;  %v1655_v31 = vand.u32 2147483648, %v1544_v49  ;;  %v1506_v62 = vmul.f32 0.5, %v3359_v59  ;;  %vm1812_vm3 = vcmp.ge.f32.partialorder %v3376_v14, 0.0 }
 0x19b   :  { %v1820_v35 = vsub.f32 0.0, %v1802_v48  ;;  %v1634_v60 = vadd.f32 %v2592_v24, %v1633_v30  ;;  %v1783_v37 = vmul.f32 1.442695, %v1768_v23  ;;  %vm1649_vm5 = vweird.f32 %v1544_v49 }
 0x19c   :  { %v1740_v19 = vadd.f32 0.2548296, %v1731_v42  ;;  %vm1654_vm6 = vcmp.eq.f32.partialorder %v1653_v28, 8.507059e+37  ;;  %v1656_v34 = vor.u32 1.1754944e-38, %v1655_v31  ;;  %v1667_v59 = vand.u32 2147483647, %v3514_v5 }
 0x19d   :  { %v1829_v54 = vsel %vm1811_vm15, %v1802_v48, %v1820_v35  ;;  %v1638_v13 = vsel %vm1637_vm1, %v2592_v24, %v1634_v60  ;;  %v2598_v16 = vpop.eup %2597  ;;  %v1669_v14 = vand.u32 2147483648, %v3514_v5  ;;  %v1760_v58 = vsub.f32 0.0, %v3496_v41 }
 0x19e   :  { %v1838_v4 = vadd.f32 1.0, %v1829_v54  ;;  %v1749_v40 = vmul.f32 %v1740_v19, %v1629_v43  ;;  %v1643_v6 = vsel %vm1640_vm2, %v1642_v21, %v1638_v13  ;;  %v1645_v18 = vmul.f32 %v2598_v16, %v1544_v49  ;;  %v2600_v33 = vpop.eup %2599 }
 0x19f   :  { %v1678_v25 = vmul.f32 1.0614054, %v1643_v6  ;;  %vm1650_vm4 = vweird.f32 %v2598_v16  ;;  %v1659_v46 = vmul.f32 %v2600_v33, %v3514_v5  ;;  %vm1664_vm8 = vweird.f32 %v2600_v33 }
 0x1a0   :  { %v1847_v20 = vmul.f32 %v1838_v4, %v1505_v17  ;;  %v1794_v27 = vmul.f32 %v2596_v7, %v1749_v40  ;;  %v1646_v1 = vsub.f32 1.0, %v1645_v18  ;;  %vm1651_vm7 = vmor %vm1649_vm5, %vm1650_vm4  ;;  %vm1663_vm9 = vweird.f32 %v3514_v5 }
 0x1a1   :  { %v1687_v52 = vadd.f32 -1.4531521, %v1678_v25  ;;  %v1660_v24 = vsub.f32 1.0, %v1659_v46  ;;  %2601 = vpow2.f32 %v1783_v37  ;;  %vm1665_vm10 = vmor %vm1663_vm9, %vm1664_vm8  ;;  %v1670_v61 = vor.u32 1.1754944e-38, %v1669_v14 }
 0x1a2   :  { %1856 = vst [vmem:[%s3557_s3 + $0x20] sm:$0xff] %v1847_v20  ;;  %v1803_v0 = vsub.f32 1.0, %v1794_v27  ;;  %v1647_v8 = vmul.f32 %v2598_v16, %v1646_v1  ;;  %vm1668_vm11 = vcmp.eq.f32.partialorder %v1667_v59, 8.507059e+37  ;;  %v1769_v48 = vmul.f32 %v1760_v58, %v3496_v41 }
 0x1a3   :  { %v1696_v43 = vmul.f32 %v1687_v52, %v1643_v6  ;;  %v1661_v51 = vmul.f32 %v2600_v33, %v1660_v24  ;;  %v1761_v55 = vsub.f32 0.0, %v3506_v39  ;;  %vm1813_vm12 = vcmp.ge.f32.partialorder %v3457_v44, 0.0 }
 0x1a4   :  { %v1821_v26 = vsub.f32 0.0, %v1803_v0  ;;  %v1648_v32 = vadd.f32 %v2598_v16, %v1647_v8  ;;  %v1785_v7 = vmul.f32 1.442695, %v1769_v48  ;;  %v1507_v52 = vmul.f32 0.5, %v3441_v22 }
 0x1a5   :  { %v1705_v29 = vadd.f32 1.4214138, %v1696_v43  ;;  %v1662_v15 = vadd.f32 %v2600_v33, %v1661_v51  ;;  %v1770_v54 = vmul.f32 %v1761_v55, %v3506_v39  ;;  %vm1814_vm13 = vcmp.ge.f32.partialorder %v3491_v3, 0.0 }
 0x1a6   :  { %v1830_v12 = vsel %vm1812_vm3, %v1803_v0, %v1821_v26  ;;  %v1652_v47 = vsel %vm1651_vm7, %v2598_v16, %v1648_v32  ;;  %2603 = vpow2.f32 %v1785_v7  ;;  %v1508_v32 = vmul.f32 0.5, %v3479_v57 }
 0x1a7   :  { %v1839_v45 = vadd.f32 1.0, %v1830_v12  ;;  %v1714_v50 = vmul.f32 %v1705_v29, %v1643_v6  ;;  %v1657_v56 = vsel %vm1654_vm6, %v1656_v34, %v1652_v47  ;;  %v1666_v9 = vsel %vm1665_vm10, %v2600_v33, %v1662_v15  ;;  %v2602_v10 = vpop.eup %2601 }
 0x1a8   :  { %v1679_v49 = vmul.f32 1.0614054, %v1657_v56  ;;  %v1671_v30 = vsel %vm1668_vm11, %v1670_v61, %v1666_v9  ;;  %v1787_v41 = vmul.f32 1.442695, %v1770_v54  ;;  %vm1815_vm14 = vcmp.ge.f32.partialorder %v3499_v11, 0.0 }
 0x1a9   :  { %v1848_v36 = vmul.f32 %v1839_v45, %v1506_v62  ;;  %v1723_v38 = vadd.f32 -0.28449672, %v1714_v50  ;;  %v1680_v35 = vmul.f32 1.0614054, %v1671_v30  ;;  %v1509_v14 = vmul.f32 0.5, %v3486_v53 }
 0x1aa   :  { %v1688_v2 = vadd.f32 -1.4531521, %v1679_v49  ;;  %2605 = vpow2.f32 %v1787_v41 }
 0x1ab   :  { %1857 = vst [vmem:[%s3557_s3 + $0x28] sm:$0xff] %v1848_v36  ;;  %v1732_v63 = vmul.f32 %v1723_v38, %v1643_v6  ;;  %v1689_v21 = vadd.f32 -1.4531521, %v1680_v35 }
 0x1ac   :  { %v1697_v5 = vmul.f32 %v1688_v2, %v1657_v56  ;;  %v2604_v33 = vpop.eup %2603 }
 0x1ad   :  { %v1741_v42 = vadd.f32 0.2548296, %v1732_v63  ;;  %v1698_v17 = vmul.f32 %v1689_v21, %v1671_v30 }
 0x1ae   :  { %v1706_v19 = vadd.f32 1.4214138, %v1697_v5 }
 0x1af   :  { %v1750_v60 = vmul.f32 %v1741_v42, %v1643_v6  ;;  %v1707_v25 = vadd.f32 1.4214138, %v1698_v17 }
 0x1b0   :  { %v1715_v16 = vmul.f32 %v1706_v19, %v1657_v56  ;;  %v2606_v44 = vpop.eup %2605 }
 0x1b1   :  { %v1795_v13 = vmul.f32 %v2602_v10, %v1750_v60  ;;  %v1716_v27 = vmul.f32 %v1707_v25, %v1671_v30 }
 0x1b2   :  { %v1724_v40 = vadd.f32 -0.28449672, %v1715_v16 }
 0x1b3   :  { %v1804_v4 = vsub.f32 1.0, %v1795_v13  ;;  %v1725_v28 = vadd.f32 -0.28449672, %v1716_v27 }
 0x1b4   :  { %v1733_v20 = vmul.f32 %v1724_v40, %v1657_v56 }
 0x1b5   :  { %v1822_v18 = vsub.f32 0.0, %v1804_v4  ;;  %v1734_v31 = vmul.f32 %v1725_v28, %v1671_v30 }
 0x1b6   :  { %v1742_v23 = vadd.f32 0.2548296, %v1733_v20 }
 0x1b7   :  { %v1831_v6 = vsel %vm1813_vm12, %v1804_v4, %v1822_v18  ;;  %v1743_v43 = vadd.f32 0.2548296, %v1734_v31 }
 0x1b8   :  { %v1840_v1 = vadd.f32 1.0, %v1831_v6  ;;  %v1751_v39 = vmul.f32 %v1742_v23, %v1657_v56 }
 0x1b9   :  { %v1752_v46 = vmul.f32 %v1743_v43, %v1671_v30 }
 0x1ba   :  { %v1849_v62 = vmul.f32 %v1840_v1, %v1507_v52  ;;  %v1796_v0 = vmul.f32 %v2604_v33, %v1751_v39 }
 0x1bb   :  { %v1797_v37 = vmul.f32 %v2606_v44, %v1752_v46 }
 0x1bc   :  { %1858 = vst [vmem:[%s3557_s3 + $0x30] sm:$0xff] %v1849_v62  ;;  %v1805_v8 = vsub.f32 1.0, %v1796_v0 }
 0x1bd   :  { %v1806_v29 = vsub.f32 1.0, %v1797_v37 }
 0x1be   :  { %v1823_v26 = vsub.f32 0.0, %v1805_v8 }
 0x1bf   :  { %v1824_v24 = vsub.f32 0.0, %v1806_v29 }
 0x1c0   :  { %v1832_v22 = vsel %vm1814_vm13, %v1805_v8, %v1823_v26 }
 0x1c1   :  { %v1841_v34 = vadd.f32 1.0, %v1832_v22  ;;  %v1833_v59 = vsel %vm1815_vm14, %v1806_v29, %v1824_v24 }
 0x1c2   :  { %v1842_v45 = vadd.f32 1.0, %v1833_v59 }
 0x1c3   :  { %v1850_v12 = vmul.f32 %v1841_v34, %v1508_v32 }
 0x1c4   :  { %v1851_v50 = vmul.f32 %v1842_v45, %v1509_v14 }
 0x1c5   :  { %1859 = vst [vmem:[%s3557_s3 + $0x38] sm:$0xff] %v1850_v12 }
 0x1c6   :  { %1860 = vst [vmem:[%s3557_s3 + $0x40] sm:$0xff] %v1851_v50 }

</bundles_post_ra>
